<compile_context>
chip_gen: v7x
topology: tpu7x:2x2x1
jax: 0.10.0
libtpu: 0.0.40
codegen_flags: <defaults>
</compile_context>

<pallas_src>
import functools

import jax
import jax.numpy as jnp
from jax.experimental import pallas as pl
from jax.experimental.pallas import tpu as pltpu


def _layer_norm(x, gamma, beta, eps=1e-5):
    # PyTorch nn.LayerNorm: biased variance, default eps=1e-5.
    mu = jnp.mean(x, axis=-1, keepdims=True)
    var = jnp.mean((x - mu) ** 2, axis=-1, keepdims=True)
    return (x - mu) * jax.lax.rsqrt(var + eps) * gamma + beta


def encoder_stack_kernel(x_ref, pad_ref,
                         wq_ref, wk_ref, wv_ref, wfc_ref,
                         ln1g_ref, ln1b_ref,
                         w1_ref, b1_ref, w2_ref, b2_ref,
                         ln2g_ref, ln2b_ref,
                         out_ref, attn_ref,
                         *, n_heads, d_k, d_v):
    layer = pl.program_id(1)

    # First layer of this batch row: seed the resident activation.  out_ref's
    # block index is constant over the layer axis -> it stays in VMEM until
    # the last layer of this batch row.
    @pl.when(layer == 0)
    def _():
        out_ref[...] = x_ref[...]

    _, S, D = out_ref.shape
    H = n_heads
    x2d = out_ref[0]                          # [S, D] resident activation
    cdt = wq_ref.dtype                        # MXU operand dtype (f32 / bf16)
    xc = x2d.astype(cdt)

    # ---- Q / K / V projections (three lane-dense matmuls, f32 accumulation) ----
    q = jnp.dot(xc, wq_ref[0], preferred_element_type=jnp.float32)   # [S, H*d_k]
    k = jnp.dot(xc, wk_ref[0], preferred_element_type=jnp.float32)   # [S, H*d_k]
    v = jnp.dot(xc, wv_ref[0], preferred_element_type=jnp.float32)   # [S, H*d_v]

    q3 = q.reshape(S, H, d_k).transpose(1, 0, 2)   # [H, S, d_k]
    k3 = k.reshape(S, H, d_k).transpose(1, 0, 2)   # [H, S, d_k]
    v3 = v.reshape(S, H, d_v).transpose(1, 0, 2)   # [H, S, d_v]

    # ---- scaled dot-product attention, heads batched in ONE contraction ----
    scale = 1.0 / (float(d_k) ** 0.5)
    scores = jnp.einsum('hqd,hkd->hqk', q3.astype(cdt), k3.astype(cdt),
                        preferred_element_type=jnp.float32) * scale   # [H, S, S]

    key_is_pad = pad_ref[0] > 0.5                 # [1, S] bool (key is padding)
    scores = jnp.where(key_is_pad[None, :, :], jnp.float32(-1e9), scores)

    scores = scores - jnp.max(scores, axis=-1, keepdims=True)
    p = jnp.exp(scores)
    denom = jnp.sum(p, axis=-1, keepdims=True)
    r = pl.reciprocal(denom, approx=True)          # EUP slot
    r = r * (2.0 - denom * r)                      # one Newton step -> ~f32 accurate
    attn = p * r                                   # [H, S, S]
    attn_ref[0, 0] = attn.astype(attn_ref.dtype)

    prob = jnp.einsum('hqk,hkd->hqd', attn.astype(cdt), v3.astype(cdt),
                      preferred_element_type=jnp.float32)             # [H, S, d_v]
    # concat heads -> one output projection matmul
    prob2d = prob.transpose(1, 0, 2).reshape(S, H * d_v)
    mha = jnp.dot(prob2d.astype(cdt), wfc_ref[0],
                  preferred_element_type=jnp.float32)                 # [S, D]

    x1 = _layer_norm(x2d + mha, ln1g_ref[0], ln1b_ref[0])             # [S, D]

    # ---- feed-forward network ----
    h1 = jnp.maximum(jnp.dot(x1.astype(cdt), w1_ref[0],
                             preferred_element_type=jnp.float32) + b1_ref[0], 0.0)
    h2 = jnp.dot(h1.astype(cdt), w2_ref[0],
                 preferred_element_type=jnp.float32) + b2_ref[0]
    y = _layer_norm(x1 + h2, ln2g_ref[0], ln2b_ref[0])

    out_ref[0] = y


def _stack_layer_params(layers_params, param_dtype):
    def stk(name, dtype=None):
        a = jnp.stack([p[name] for p in layers_params])
        return a.astype(dtype) if dtype is not None else a
    return dict(
        wq=stk('wq', param_dtype), wk=stk('wk', param_dtype),
        wv=stk('wv', param_dtype), wfc=stk('wfc', param_dtype),
        ln1g=stk('ln1g'), ln1b=stk('ln1b'),
        w1=stk('w1', param_dtype), b1=stk('b1'),
        w2=stk('w2', param_dtype), b2=stk('b2'),
        ln2g=stk('ln2g'), ln2b=stk('ln2b'),
    )


def encoder_forward(x, layers_params, *, n_heads, d_k, d_v,
                    param_dtype=jnp.float32, attn_dtype=jnp.float32):
    B, S, D = x.shape
    L = len(layers_params)
    H = n_heads
    d_ff = layers_params[0]['w1'].shape[1]

    # get_attn_pad_mask(x[:, :, 0], x[:, :, 0]): key k is padding iff x[b,k,0]==0.
    pad = (x[:, :, 0] == 0.0).astype(jnp.float32).reshape(B, 1, S)     # [B,1,S]

    sp = _stack_layer_params(layers_params, param_dtype)
    names = ('wq', 'wk', 'wv', 'wfc', 'ln1g', 'ln1b',
             'w1', 'b1', 'w2', 'b2', 'ln2g', 'ln2b')
    weights = [sp[n] for n in names]

    def wspec(w):
        nd = w.ndim
        return pl.BlockSpec((1,) + w.shape[1:],
                            lambda b, l, _nd=nd: (l,) + (0,) * (_nd - 1))

    in_specs = ([pl.BlockSpec((1, S, D), lambda b, l: (b, 0, 0)),
                 pl.BlockSpec((1, 1, S), lambda b, l: (b, 0, 0))]
                + [wspec(w) for w in weights])
    out_specs = (pl.BlockSpec((1, S, D), lambda b, l: (b, 0, 0)),
                 pl.BlockSpec((1, 1, H, S, S), lambda b, l: (l, b, 0, 0, 0)))
    out_shape = (jax.ShapeDtypeStruct((B, S, D), jnp.float32),
                 jax.ShapeDtypeStruct((L, B, H, S, S), attn_dtype))

    # advisory cost estimate for XLA scheduling around the fused stack
    flops_row = (2 * S * D * (H * d_k) * 2            # Q, K
                 + 2 * S * D * (H * d_v)              # V
                 + 2 * H * S * S * d_k                # scores
                 + 2 * H * S * S * d_v                # attn @ V
                 + 2 * S * (H * d_v) * D              # output projection
                 + 2 * S * D * d_ff + 2 * S * d_ff * D)   # FFN
    cost = pl.CostEstimate(
        flops=int(L * B * flops_row),
        transcendentals=int(L * B * (H * S * S + H * S)),
        bytes_accessed=int(x.size * 4 + pad.size * 4
                           + B * sum(int(w.size) * w.dtype.itemsize for w in weights)
                           + B * S * D * 4
                           + L * B * H * S * S * jnp.dtype(attn_dtype).itemsize))

    kernel = functools.partial(encoder_stack_kernel,
                               n_heads=n_heads, d_k=d_k, d_v=d_v)
    out, attn_all = pl.pallas_call(
        kernel,
        grid=(B, L),
        in_specs=in_specs,
        out_specs=out_specs,
        out_shape=out_shape,
        compiler_params=pltpu.CompilerParams(
            dimension_semantics=("parallel", "arbitrary")),
        cost_estimate=cost,
    )(x, pad, *weights)

    attns = [attn_all[l] for l in range(L)]            # each [B, H, S, S]
    return out, attns


# ---------------- pure-JAX reference (for correctness check) ----------------
def _reference_layer(x, mask_bool, p, *, n_heads, d_k, d_v):
    B, S, D = x.shape
    q = (x @ p['wq']).reshape(B, S, n_heads, d_k).transpose(0, 2, 1, 3)
    k = (x @ p['wk']).reshape(B, S, n_heads, d_k).transpose(0, 2, 1, 3)
    v = (x @ p['wv']).reshape(B, S, n_heads, d_v).transpose(0, 2, 1, 3)
    scores = jnp.einsum('bhqd,bhkd->bhqk', q, k) / jnp.sqrt(jnp.float32(d_k))
    scores = jnp.where(mask_bool[:, None, :, :], -1e9, scores)
    attn = jax.nn.softmax(scores, axis=-1)
    prob = jnp.einsum('bhqk,bhkd->bhqd', attn, v)
    prob = prob.transpose(0, 2, 1, 3).reshape(B, S, n_heads * d_v)
    out = prob @ p['wfc']
    x1 = _layer_norm(x + out, p['ln1g'][None], p['ln1b'][None])
    h1 = jnp.maximum(x1 @ p['w1'] + p['b1'][None], 0.0)
    h2 = h1 @ p['w2'] + p['b2'][None]
    return _layer_norm(x1 + h2, p['ln2g'][None], p['ln2b'][None]), attn


def _reference_forward(x, layers_params, *, n_heads, d_k, d_v):
    seq = x[:, :, 0]
    B, S = seq.shape
    mask_bool = jnp.broadcast_to((seq == 0.0)[:, None, :], (B, S, S))
    out, attns = x, []
    for p in layers_params:
        out, a = _reference_layer(out, mask_bool, p,
                                  n_heads=n_heads, d_k=d_k, d_v=d_v)
        attns.append(a)
    return out, attns


# ---------------- deterministic parameter init ----------------
def init_layer_params(key, d_model, d_k, d_v, n_heads, d_ff):
    ks = jax.random.split(key, 6)
    s = 0.05
    return dict(
        wq=jax.random.normal(ks[0], (d_model, n_heads * d_k), jnp.float32) * s,
        wk=jax.random.normal(ks[1], (d_model, n_heads * d_k), jnp.float32) * s,
        wv=jax.random.normal(ks[2], (d_model, n_heads * d_v), jnp.float32) * s,
        wfc=jax.random.normal(ks[3], (n_heads * d_v, d_model), jnp.float32) * s,
        ln1g=jnp.ones((1, d_model), jnp.float32),
        ln1b=jnp.zeros((1, d_model), jnp.float32),
        w1=jax.random.normal(ks[4], (d_model, d_ff), jnp.float32) * s,
        b1=jnp.zeros((1, d_ff), jnp.float32),
        w2=jax.random.normal(ks[5], (d_ff, d_model), jnp.float32) * s,
        b2=jnp.zeros((1, d_model), jnp.float32),
        ln2g=jnp.ones((1, d_model), jnp.float32),
        ln2b=jnp.zeros((1, d_model), jnp.float32),
    )


if __name__ == "__main__":
    B, S, D = 2, 8, 32
    n_heads, d_k, d_v, d_ff = 4, 8, 8, 64
    num_layers = 2

    key = jax.random.PRNGKey(0)
    kx, kp = jax.random.split(key)
    x = jax.random.normal(kx, (B, S, D), jnp.float32)
    # make the last two tokens "padding" (feature 0 == 0) so the mask is exercised
    x = x.at[:, -2:, 0].set(0.0)

    layer_keys = jax.random.split(kp, num_layers)
    layers_params = [init_layer_params(k, D, d_k, d_v, n_heads, d_ff)
                     for k in layer_keys]

    # ---- strict f32 run ----
    out, attns = encoder_forward(x, layers_params,
                                 n_heads=n_heads, d_k=d_k, d_v=d_v,
                                 param_dtype=jnp.float32)
    out = jax.block_until_ready(out)
    attns = [jax.block_until_ready(a) for a in attns]

    ref_out, ref_attns = _reference_forward(x, layers_params,
                                            n_heads=n_heads, d_k=d_k, d_v=d_v)
    assert out.shape == (B, S, D)
    assert all(a.shape == (B, n_heads, S, S) for a in attns)
    assert jnp.allclose(out, ref_out, atol=1e-3), "encoder output mismatch"
    for a, ra in zip(attns, ref_attns):
        assert jnp.allclose(a, ra, atol=1e-3), "attention weights mismatch"

    # ---- bf16 MXU-operand run (performance config; f32 accumulation) ----
    out_bf, attns_bf = encoder_forward(x, layers_params,
                                       n_heads=n_heads, d_k=d_k, d_v=d_v,
                                       param_dtype=jnp.bfloat16)
    out_bf = jax.block_until_ready(out_bf)
    assert out_bf.shape == (B, S, D)
    assert bool(jnp.all(jnp.isfinite(out_bf)))
    assert float(jnp.max(jnp.abs(out_bf - ref_out))) < 0.15, "bf16 run diverged"

    print("KERNEL_OK")
</pallas_src>

<mosaic_0001>
module attributes {stable_mosaic.version = 11 : i64} {
  func.func @encoder_stack_kernel(%arg0: i32, %arg1: i32, %arg2: memref<1x8x32xf32, #tpu.memory_space<vmem>>, %arg3: memref<1x1x8xf32, #tpu.memory_space<vmem>>, %arg4: memref<1x32x32xf32, #tpu.memory_space<vmem>>, %arg5: memref<1x32x32xf32, #tpu.memory_space<vmem>>, %arg6: memref<1x32x32xf32, #tpu.memory_space<vmem>>, %arg7: memref<1x32x32xf32, #tpu.memory_space<vmem>>, %arg8: memref<1x1x32xf32, #tpu.memory_space<vmem>>, %arg9: memref<1x1x32xf32, #tpu.memory_space<vmem>>, %arg10: memref<1x32x64xf32, #tpu.memory_space<vmem>>, %arg11: memref<1x1x64xf32, #tpu.memory_space<vmem>>, %arg12: memref<1x64x32xf32, #tpu.memory_space<vmem>>, %arg13: memref<1x1x32xf32, #tpu.memory_space<vmem>>, %arg14: memref<1x1x32xf32, #tpu.memory_space<vmem>>, %arg15: memref<1x1x32xf32, #tpu.memory_space<vmem>>, %arg16: memref<1x8x32xf32, #tpu.memory_space<vmem>>, %arg17: memref<1x1x4x8x8xf32, #tpu.memory_space<vmem>>) attributes {dimension_semantics = [#tpu.dimension_semantics<parallel>, #tpu.dimension_semantics<arbitrary>], iteration_bounds = array<i64: 2, 2>, scalar_prefetch = 0 : i64, scratch_operands = 0 : i64, tpu.core_type = #tpu.core_type<tc>, window_params = [{transform_indices = @transform_0, window_bounds = array<i64: 1, 8, 32>}, {transform_indices = @transform_1, window_bounds = array<i64: 1, 1, 8>}, {transform_indices = @transform_2, window_bounds = array<i64: 1, 32, 32>}, {transform_indices = @transform_3, window_bounds = array<i64: 1, 32, 32>}, {transform_indices = @transform_4, window_bounds = array<i64: 1, 32, 32>}, {transform_indices = @transform_5, window_bounds = array<i64: 1, 32, 32>}, {transform_indices = @transform_6, window_bounds = array<i64: 1, 1, 32>}, {transform_indices = @transform_7, window_bounds = array<i64: 1, 1, 32>}, {transform_indices = @transform_8, window_bounds = array<i64: 1, 32, 64>}, {transform_indices = @transform_9, window_bounds = array<i64: 1, 1, 64>}, {transform_indices = @transform_10, window_bounds = array<i64: 1, 64, 32>}, {transform_indices = @transform_11, window_bounds = array<i64: 1, 1, 32>}, {transform_indices = @transform_12, window_bounds = array<i64: 1, 1, 32>}, {transform_indices = @transform_13, window_bounds = array<i64: 1, 1, 32>}, {transform_indices = @transform_14, window_bounds = array<i64: 1, 8, 32>}, {transform_indices = @transform_15, window_bounds = array<i64: 1, 1, 4, 8, 8>}]} {
    %c0_i32 = arith.constant 0 : i32
    %0 = arith.cmpi eq, %arg1, %c0_i32 : i32
    %1 = arith.extui %0 : i1 to i32
    %c0_i32_0 = arith.constant 0 : i32
    %2 = arith.cmpi ne, %1, %c0_i32_0 : i32
    scf.if %2 {
      %c0_74 = arith.constant 0 : index
      %c0_75 = arith.constant 0 : index
      %c0_76 = arith.constant 0 : index
      %128 = vector.load %arg2[%c0_74, %c0_75, %c0_76] : memref<1x8x32xf32, #tpu.memory_space<vmem>>, vector<1x8x32xf32>
      %c0_77 = arith.constant 0 : index
      %c0_78 = arith.constant 0 : index
      %c0_79 = arith.constant 0 : index
      %129 = vector.load %arg16[%c0_77, %c0_78, %c0_79] : memref<1x8x32xf32, #tpu.memory_space<vmem>>, vector<1x8x32xf32>
      tpu.vector_store %arg16[%c0_77, %c0_78, %c0_79], %128 {strides = array<i32>} : memref<1x8x32xf32, #tpu.memory_space<vmem>>, vector<1x8x32xf32>,
    } else {
    }
    %c0 = arith.constant 0 : index
    %c0_1 = arith.constant 0 : index
    %c0_2 = arith.constant 0 : index
    %3 = vector.load %arg16[%c0, %c0_1, %c0_2] : memref<1x8x32xf32, #tpu.memory_space<vmem>>, vector<1x8x32xf32>
    %4 = vector.shape_cast %3 : vector<1x8x32xf32> to vector<8x32xf32>
    %c0_3 = arith.constant 0 : index
    %c0_4 = arith.constant 0 : index
    %c0_5 = arith.constant 0 : index
    %5 = vector.load %arg4[%c0_3, %c0_4, %c0_5] : memref<1x32x32xf32, #tpu.memory_space<vmem>>, vector<1x32x32xf32>
    %6 = vector.shape_cast %5 : vector<1x32x32xf32> to vector<32x32xf32>
    %cst = arith.constant dense<0.000000e+00> : vector<8x32xf32>
    %7 = tpu.matmul %4, %6, %cst {dimension_numbers = #tpu.dot_dimension_numbers<[1], [0], [0], [1], [0, 0, 1, 1], [], []>} : vector<8x32xf32>, vector<32x32xf32>, vector<8x32xf32> -> vector<8x32xf32>
    %c0_6 = arith.constant 0 : index
    %c0_7 = arith.constant 0 : index
    %c0_8 = arith.constant 0 : index
    %8 = vector.load %arg5[%c0_6, %c0_7, %c0_8] : memref<1x32x32xf32, #tpu.memory_space<vmem>>, vector<1x32x32xf32>
    %9 = vector.shape_cast %8 : vector<1x32x32xf32> to vector<32x32xf32>
    %cst_9 = arith.constant dense<0.000000e+00> : vector<8x32xf32>
    %10 = tpu.matmul %4, %9, %cst_9 {dimension_numbers = #tpu.dot_dimension_numbers<[1], [0], [0], [1], [0, 0, 1, 1], [], []>} : vector<8x32xf32>, vector<32x32xf32>, vector<8x32xf32> -> vector<8x32xf32>
    %c0_10 = arith.constant 0 : index
    %c0_11 = arith.constant 0 : index
    %c0_12 = arith.constant 0 : index
    %11 = vector.load %arg6[%c0_10, %c0_11, %c0_12] : memref<1x32x32xf32, #tpu.memory_space<vmem>>, vector<1x32x32xf32>
    %12 = vector.shape_cast %11 : vector<1x32x32xf32> to vector<32x32xf32>
    %cst_13 = arith.constant dense<0.000000e+00> : vector<8x32xf32>
    %13 = tpu.matmul %4, %12, %cst_13 {dimension_numbers = #tpu.dot_dimension_numbers<[1], [0], [0], [1], [0, 0, 1, 1], [], []>} : vector<8x32xf32>, vector<32x32xf32>, vector<8x32xf32> -> vector<8x32xf32>
    %14 = vector.shape_cast %7 : vector<8x32xf32> to vector<8x4x8xf32>
    %15 = tpu.transpose %14, [1, 0, 2] : vector<8x4x8xf32> -> vector<4x8x8xf32>
    %16 = vector.shape_cast %10 : vector<8x32xf32> to vector<8x4x8xf32>
    %17 = tpu.transpose %16, [1, 0, 2] : vector<8x4x8xf32> -> vector<4x8x8xf32>
    %18 = vector.shape_cast %13 : vector<8x32xf32> to vector<8x4x8xf32>
    %19 = tpu.transpose %18, [1, 0, 2] : vector<8x4x8xf32> -> vector<4x8x8xf32>
    "tpu.trace_start"() <{level = 10 : i32, message = "hqd,hkd->hqk"}> : () -> ()
    %cst_14 = arith.constant dense<0.000000e+00> : vector<4x8x8xf32>
    %20 = tpu.matmul %15, %17, %cst_14 {dimension_numbers = #tpu.dot_dimension_numbers<[2], [2], [1], [1], [0, 0, 0, 1, 1, 1], [0], [0]>} : vector<4x8x8xf32>, vector<4x8x8xf32>, vector<4x8x8xf32> -> vector<4x8x8xf32>
    "tpu.trace_stop"() : () -> ()
    %cst_15 = arith.constant 0.353553385 : f32
    %21 = vector.broadcast %cst_15 : f32 to vector<4x8x8xf32>
    %22 = arith.mulf %20, %21 : vector<4x8x8xf32>
    %c0_16 = arith.constant 0 : index
    %c0_17 = arith.constant 0 : index
    %c0_18 = arith.constant 0 : index
    %23 = vector.load %arg3[%c0_16, %c0_17, %c0_18] : memref<1x1x8xf32, #tpu.memory_space<vmem>>, vector<1x1x8xf32>
    %24 = vector.shape_cast %23 : vector<1x1x8xf32> to vector<1x8xf32>
    %cst_19 = arith.constant 5.000000e-01 : f32
    %25 = vector.broadcast %cst_19 : f32 to vector<1x8xf32>
    %26 = arith.cmpf ogt, %24, %25 : vector<1x8xf32>
    %27 = vector.shape_cast %26 : vector<1x8xi1> to vector<1x1x8xi1>
    %cst_20 = arith.constant -1.000000e+09 : f32
    %28 = vector.shape_cast %27 : vector<1x1x8xi1> to vector<1x1x8xi1>
    %29 = vector.broadcast %28 : vector<1x1x8xi1> to vector<4x8x8xi1>
    %30 = vector.broadcast %cst_20 : f32 to vector<4x8x8xf32>
    %31 = arith.select %29, %30, %22 : vector<4x8x8xi1>, vector<4x8x8xf32>
    %cst_21 = arith.constant dense<0xFF800000> : vector<4x8xf32>
    %32 = vector.multi_reduction <maximumf>, %31, %cst_21 [2] : vector<4x8x8xf32> to vector<4x8xf32>
    %33 = vector.shape_cast %32 : vector<4x8xf32> to vector<4x8x1xf32>
    %34 = vector.broadcast %33 : vector<4x8x1xf32> to vector<4x8x8xf32>
    %35 = arith.subf %31, %34 : vector<4x8x8xf32>
    %36 = math.exp %35 : vector<4x8x8xf32>
    %cst_22 = arith.constant dense<0.000000e+00> : vector<4x8xf32>
    %37 = vector.multi_reduction <add>, %36, %cst_22 [2] : vector<4x8x8xf32> to vector<4x8xf32>
    %38 = vector.shape_cast %37 : vector<4x8xf32> to vector<4x8x1xf32>
    %39 = tpu.reciprocal %38 {approx = true} : vector<4x8x1xf32> -> vector<4x8x1xf32>
    %40 = arith.mulf %38, %39 : vector<4x8x1xf32>
    %cst_23 = arith.constant 2.000000e+00 : f32
    %41 = vector.broadcast %cst_23 : f32 to vector<4x8x1xf32>
    %42 = arith.subf %41, %40 : vector<4x8x1xf32>
    %43 = arith.mulf %39, %42 : vector<4x8x1xf32>
    %44 = vector.broadcast %43 : vector<4x8x1xf32> to vector<4x8x8xf32>
    %45 = arith.mulf %36, %44 : vector<4x8x8xf32>
    %c0_24 = arith.constant 0 : index
    %c0_25 = arith.constant 0 : index
    %c0_26 = arith.constant 0 : index
    %c0_27 = arith.constant 0 : index
    %c0_28 = arith.constant 0 : index
    %46 = vector.load %arg17[%c0_24, %c0_25, %c0_26, %c0_27, %c0_28] : memref<1x1x4x8x8xf32, #tpu.memory_space<vmem>>, vector<1x1x4x8x8xf32>
    %47 = vector.shape_cast %46 : vector<1x1x4x8x8xf32> to vector<4x8x8xf32>
    %48 = vector.shape_cast %45 : vector<4x8x8xf32> to vector<1x1x4x8x8xf32>
    tpu.vector_store %arg17[%c0_24, %c0_25, %c0_26, %c0_27, %c0_28], %48 {strides = array<i32>} : memref<1x1x4x8x8xf32, #tpu.memory_space<vmem>>, vector<1x1x4x8x8xf32>,
    "tpu.trace_start"() <{level = 10 : i32, message = "hqk,hkd->hqd"}> : () -> ()
    %cst_29 = arith.constant dense<0.000000e+00> : vector<4x8x8xf32>
    %49 = tpu.matmul %45, %19, %cst_29 {dimension_numbers = #tpu.dot_dimension_numbers<[2], [1], [1], [2], [0, 0, 0, 1, 1, 2], [0], [0]>} : vector<4x8x8xf32>, vector<4x8x8xf32>, vector<4x8x8xf32> -> vector<4x8x8xf32>
    "tpu.trace_stop"() : () -> ()
    %50 = tpu.transpose %49, [1, 0, 2] : vector<4x8x8xf32> -> vector<8x4x8xf32>
    %51 = vector.shape_cast %50 : vector<8x4x8xf32> to vector<8x32xf32>
    %c0_30 = arith.constant 0 : index
    %c0_31 = arith.constant 0 : index
    %c0_32 = arith.constant 0 : index
    %52 = vector.load %arg7[%c0_30, %c0_31, %c0_32] : memref<1x32x32xf32, #tpu.memory_space<vmem>>, vector<1x32x32xf32>
    %53 = vector.shape_cast %52 : vector<1x32x32xf32> to vector<32x32xf32>
    %cst_33 = arith.constant dense<0.000000e+00> : vector<8x32xf32>
    %54 = tpu.matmul %51, %53, %cst_33 {dimension_numbers = #tpu.dot_dimension_numbers<[1], [0], [0], [1], [0, 0, 1, 1], [], []>} : vector<8x32xf32>, vector<32x32xf32>, vector<8x32xf32> -> vector<8x32xf32>
    %55 = arith.addf %4, %54 : vector<8x32xf32>
    %c0_34 = arith.constant 0 : index
    %c0_35 = arith.constant 0 : index
    %c0_36 = arith.constant 0 : index
    %56 = vector.load %arg8[%c0_34, %c0_35, %c0_36] : memref<1x1x32xf32, #tpu.memory_space<vmem>>, vector<1x1x32xf32>
    %57 = vector.shape_cast %56 : vector<1x1x32xf32> to vector<1x32xf32>
    %c0_37 = arith.constant 0 : index
    %c0_38 = arith.constant 0 : index
    %c0_39 = arith.constant 0 : index
    %58 = vector.load %arg9[%c0_37, %c0_38, %c0_39] : memref<1x1x32xf32, #tpu.memory_space<vmem>>, vector<1x1x32xf32>
    %59 = vector.shape_cast %58 : vector<1x1x32xf32> to vector<1x32xf32>
    %cst_40 = arith.constant dense<0.000000e+00> : vector<8xf32>
    %60 = vector.multi_reduction <add>, %55, %cst_40 [1] : vector<8x32xf32> to vector<8xf32>
    %61 = vector.shape_cast %60 : vector<8xf32> to vector<8x1xf32>
    %cst_41 = arith.constant 3.200000e+01 : f32
    %62 = vector.broadcast %cst_41 : f32 to vector<8x1xf32>
    %63 = arith.divf %61, %62 : vector<8x1xf32>
    %64 = vector.broadcast %63 : vector<8x1xf32> to vector<8x32xf32>
    %65 = arith.subf %55, %64 : vector<8x32xf32>
    %66 = arith.mulf %65, %65 : vector<8x32xf32>
    %cst_42 = arith.constant dense<0.000000e+00> : vector<8xf32>
    %67 = vector.multi_reduction <add>, %66, %cst_42 [1] : vector<8x32xf32> to vector<8xf32>
    %68 = vector.shape_cast %67 : vector<8xf32> to vector<8x1xf32>
    %cst_43 = arith.constant 3.200000e+01 : f32
    %69 = vector.broadcast %cst_43 : f32 to vector<8x1xf32>
    %70 = arith.divf %68, %69 : vector<8x1xf32>
    %71 = vector.broadcast %63 : vector<8x1xf32> to vector<8x32xf32>
    %72 = arith.subf %55, %71 : vector<8x32xf32>
    %cst_44 = arith.constant 9.99999974E-6 : f32
    %73 = vector.broadcast %cst_44 : f32 to vector<8x1xf32>
    %74 = arith.addf %70, %73 : vector<8x1xf32>
    %75 = math.rsqrt %74 : vector<8x1xf32>
    %76 = vector.broadcast %75 : vector<8x1xf32> to vector<8x32xf32>
    %77 = arith.mulf %72, %76 : vector<8x32xf32>
    %78 = vector.broadcast %57 : vector<1x32xf32> to vector<8x32xf32>
    %79 = arith.mulf %77, %78 : vector<8x32xf32>
    %80 = vector.broadcast %59 : vector<1x32xf32> to vector<8x32xf32>
    %81 = arith.addf %79, %80 : vector<8x32xf32>
    %c0_45 = arith.constant 0 : index
    %c0_46 = arith.constant 0 : index
    %c0_47 = arith.constant 0 : index
    %82 = vector.load %arg10[%c0_45, %c0_46, %c0_47] : memref<1x32x64xf32, #tpu.memory_space<vmem>>, vector<1x32x64xf32>
    %83 = vector.shape_cast %82 : vector<1x32x64xf32> to vector<32x64xf32>
    %cst_48 = arith.constant dense<0.000000e+00> : vector<8x64xf32>
    %84 = tpu.matmul %81, %83, %cst_48 {dimension_numbers = #tpu.dot_dimension_numbers<[1], [0], [0], [1], [0, 0, 1, 1], [], []>} : vector<8x32xf32>, vector<32x64xf32>, vector<8x64xf32> -> vector<8x64xf32>
    %c0_49 = arith.constant 0 : index
    %c0_50 = arith.constant 0 : index
    %c0_51 = arith.constant 0 : index
    %85 = vector.load %arg11[%c0_49, %c0_50, %c0_51] : memref<1x1x64xf32, #tpu.memory_space<vmem>>, vector<1x1x64xf32>
    %86 = vector.shape_cast %85 : vector<1x1x64xf32> to vector<1x64xf32>
    %87 = vector.broadcast %86 : vector<1x64xf32> to vector<8x64xf32>
    %88 = arith.addf %84, %87 : vector<8x64xf32>
    %cst_52 = arith.constant 0.000000e+00 : f32
    %89 = vector.broadcast %cst_52 : f32 to vector<8x64xf32>
    %90 = arith.maximumf %88, %89 : vector<8x64xf32>
    %c0_53 = arith.constant 0 : index
    %c0_54 = arith.constant 0 : index
    %c0_55 = arith.constant 0 : index
    %91 = vector.load %arg12[%c0_53, %c0_54, %c0_55] : memref<1x64x32xf32, #tpu.memory_space<vmem>>, vector<1x64x32xf32>
    %92 = vector.shape_cast %91 : vector<1x64x32xf32> to vector<64x32xf32>
    %cst_56 = arith.constant dense<0.000000e+00> : vector<8x32xf32>
    %93 = tpu.matmul %90, %92, %cst_56 {dimension_numbers = #tpu.dot_dimension_numbers<[1], [0], [0], [1], [0, 0, 1, 1], [], []>} : vector<8x64xf32>, vector<64x32xf32>, vector<8x32xf32> -> vector<8x32xf32>
    %c0_57 = arith.constant 0 : index
    %c0_58 = arith.constant 0 : index
    %c0_59 = arith.constant 0 : index
    %94 = vector.load %arg13[%c0_57, %c0_58, %c0_59] : memref<1x1x32xf32, #tpu.memory_space<vmem>>, vector<1x1x32xf32>
    %95 = vector.shape_cast %94 : vector<1x1x32xf32> to vector<1x32xf32>
    %96 = vector.broadcast %95 : vector<1x32xf32> to vector<8x32xf32>
    %97 = arith.addf %93, %96 : vector<8x32xf32>
    %98 = arith.addf %81, %97 : vector<8x32xf32>
    %c0_60 = arith.constant 0 : index
    %c0_61 = arith.constant 0 : index
    %c0_62 = arith.constant 0 : index
    %99 = vector.load %arg14[%c0_60, %c0_61, %c0_62] : memref<1x1x32xf32, #tpu.memory_space<vmem>>, vector<1x1x32xf32>
    %100 = vector.shape_cast %99 : vector<1x1x32xf32> to vector<1x32xf32>
    %c0_63 = arith.constant 0 : index
    %c0_64 = arith.constant 0 : index
    %c0_65 = arith.constant 0 : index
    %101 = vector.load %arg15[%c0_63, %c0_64, %c0_65] : memref<1x1x32xf32, #tpu.memory_space<vmem>>, vector<1x1x32xf32>
    %102 = vector.shape_cast %101 : vector<1x1x32xf32> to vector<1x32xf32>
    %cst_66 = arith.constant dense<0.000000e+00> : vector<8xf32>
    %103 = vector.multi_reduction <add>, %98, %cst_66 [1] : vector<8x32xf32> to vector<8xf32>
    %104 = vector.shape_cast %103 : vector<8xf32> to vector<8x1xf32>
    %cst_67 = arith.constant 3.200000e+01 : f32
    %105 = vector.broadcast %cst_67 : f32 to vector<8x1xf32>
    %106 = arith.divf %104, %105 : vector<8x1xf32>
    %107 = vector.broadcast %106 : vector<8x1xf32> to vector<8x32xf32>
    %108 = arith.subf %98, %107 : vector<8x32xf32>
    %109 = arith.mulf %108, %108 : vector<8x32xf32>
    %cst_68 = arith.constant dense<0.000000e+00> : vector<8xf32>
    %110 = vector.multi_reduction <add>, %109, %cst_68 [1] : vector<8x32xf32> to vector<8xf32>
    %111 = vector.shape_cast %110 : vector<8xf32> to vector<8x1xf32>
    %cst_69 = arith.constant 3.200000e+01 : f32
    %112 = vector.broadcast %cst_69 : f32 to vector<8x1xf32>
    %113 = arith.divf %111, %112 : vector<8x1xf32>
    %114 = vector.broadcast %106 : vector<8x1xf32> to vector<8x32xf32>
    %115 = arith.subf %98, %114 : vector<8x32xf32>
    %cst_70 = arith.constant 9.99999974E-6 : f32
    %116 = vector.broadcast %cst_70 : f32 to vector<8x1xf32>
    %117 = arith.addf %113, %116 : vector<8x1xf32>
    %118 = math.rsqrt %117 : vector<8x1xf32>
    %119 = vector.broadcast %118 : vector<8x1xf32> to vector<8x32xf32>
    %120 = arith.mulf %115, %119 : vector<8x32xf32>
    %121 = vector.broadcast %100 : vector<1x32xf32> to vector<8x32xf32>
    %122 = arith.mulf %120, %121 : vector<8x32xf32>
    %123 = vector.broadcast %102 : vector<1x32xf32> to vector<8x32xf32>
    %124 = arith.addf %122, %123 : vector<8x32xf32>
    %c0_71 = arith.constant 0 : index
    %c0_72 = arith.constant 0 : index
    %c0_73 = arith.constant 0 : index
    %125 = vector.load %arg16[%c0_71, %c0_72, %c0_73] : memref<1x8x32xf32, #tpu.memory_space<vmem>>, vector<1x8x32xf32>
    %126 = vector.shape_cast %125 : vector<1x8x32xf32> to vector<8x32xf32>
    %127 = vector.shape_cast %124 : vector<8x32xf32> to vector<1x8x32xf32>
    tpu.vector_store %arg16[%c0_71, %c0_72, %c0_73], %127 {strides = array<i32>} : memref<1x8x32xf32, #tpu.memory_space<vmem>>, vector<1x8x32xf32>,
    return
  }
  func.func @transform_0(%arg0: i32, %arg1: i32) -> (i32, i32, i32) {
    %c0_i32 = arith.constant 0 : i32
    %c0_i32_0 = arith.constant 0 : i32
    %c0_i32_1 = arith.constant 0 : i32
    return %arg0, %c0_i32, %c0_i32_0 : i32, i32, i32
  }
  func.func @transform_1(%arg0: i32, %arg1: i32) -> (i32, i32, i32) {
    %c0_i32 = arith.constant 0 : i32
    %c0_i32_0 = arith.constant 0 : i32
    %c0_i32_1 = arith.constant 0 : i32
    return %arg0, %c0_i32, %c0_i32_0 : i32, i32, i32
  }
  func.func @transform_2(%arg0: i32, %arg1: i32) -> (i32, i32, i32) {
    %c0_i32 = arith.constant 0 : i32
    %c0_i32_0 = arith.constant 0 : i32
    %c0_i32_1 = arith.constant 0 : i32
    return %arg1, %c0_i32, %c0_i32_0 : i32, i32, i32
  }
  func.func @transform_3(%arg0: i32, %arg1: i32) -> (i32, i32, i32) {
    %c0_i32 = arith.constant 0 : i32
    %c0_i32_0 = arith.constant 0 : i32
    %c0_i32_1 = arith.constant 0 : i32
    return %arg1, %c0_i32, %c0_i32_0 : i32, i32, i32
  }
  func.func @transform_4(%arg0: i32, %arg1: i32) -> (i32, i32, i32) {
    %c0_i32 = arith.constant 0 : i32
    %c0_i32_0 = arith.constant 0 : i32
    %c0_i32_1 = arith.constant 0 : i32
    return %arg1, %c0_i32, %c0_i32_0 : i32, i32, i32
  }
  func.func @transform_5(%arg0: i32, %arg1: i32) -> (i32, i32, i32) {
    %c0_i32 = arith.constant 0 : i32
    %c0_i32_0 = arith.constant 0 : i32
    %c0_i32_1 = arith.constant 0 : i32
    return %arg1, %c0_i32, %c0_i32_0 : i32, i32, i32
  }
  func.func @transform_6(%arg0: i32, %arg1: i32) -> (i32, i32, i32) {
    %c0_i32 = arith.constant 0 : i32
    %c0_i32_0 = arith.constant 0 : i32
    %c0_i32_1 = arith.constant 0 : i32
    return %arg1, %c0_i32, %c0_i32_0 : i32, i32, i32
  }
  func.func @transform_7(%arg0: i32, %arg1: i32) -> (i32, i32, i32) {
    %c0_i32 = arith.constant 0 : i32
    %c0_i32_0 = arith.constant 0 : i32
    %c0_i32_1 = arith.constant 0 : i32
    return %arg1, %c0_i32, %c0_i32_0 : i32, i32, i32
  }
  func.func @transform_8(%arg0: i32, %arg1: i32) -> (i32, i32, i32) {
    %c0_i32 = arith.constant 0 : i32
    %c0_i32_0 = arith.constant 0 : i32
    %c0_i32_1 = arith.constant 0 : i32
    return %arg1, %c0_i32, %c0_i32_0 : i32, i32, i32
  }
  func.func @transform_9(%arg0: i32, %arg1: i32) -> (i32, i32, i32) {
    %c0_i32 = arith.constant 0 : i32
    %c0_i32_0 = arith.constant 0 : i32
    %c0_i32_1 = arith.constant 0 : i32
    return %arg1, %c0_i32, %c0_i32_0 : i32, i32, i32
  }
  func.func @transform_10(%arg0: i32, %arg1: i32) -> (i32, i32, i32) {
    %c0_i32 = arith.constant 0 : i32
    %c0_i32_0 = arith.constant 0 : i32
    %c0_i32_1 = arith.constant 0 : i32
    return %arg1, %c0_i32, %c0_i32_0 : i32, i32, i32
  }
  func.func @transform_11(%arg0: i32, %arg1: i32) -> (i32, i32, i32) {
    %c0_i32 = arith.constant 0 : i32
    %c0_i32_0 = arith.constant 0 : i32
    %c0_i32_1 = arith.constant 0 : i32
    return %arg1, %c0_i32, %c0_i32_0 : i32, i32, i32
  }
  func.func @transform_12(%arg0: i32, %arg1: i32) -> (i32, i32, i32) {
    %c0_i32 = arith.constant 0 : i32
    %c0_i32_0 = arith.constant 0 : i32
    %c0_i32_1 = arith.constant 0 : i32
    return %arg1, %c0_i32, %c0_i32_0 : i32, i32, i32
  }
  func.func @transform_13(%arg0: i32, %arg1: i32) -> (i32, i32, i32) {
    %c0_i32 = arith.constant 0 : i32
    %c0_i32_0 = arith.constant 0 : i32
    %c0_i32_1 = arith.constant 0 : i32
    return %arg1, %c0_i32, %c0_i32_0 : i32, i32, i32
  }
  func.func @transform_14(%arg0: i32, %arg1: i32) -> (i32, i32, i32) {
    %c0_i32 = arith.constant 0 : i32
    %c0_i32_0 = arith.constant 0 : i32
    %c0_i32_1 = arith.constant 0 : i32
    return %arg0, %c0_i32, %c0_i32_0 : i32, i32, i32
  }
  func.func @transform_15(%arg0: i32, %arg1: i32) -> (i32, i32, i32, i32, i32) {
    %c0_i32 = arith.constant 0 : i32
    %c0_i32_0 = arith.constant 0 : i32
    %c0_i32_1 = arith.constant 0 : i32
    %c0_i32_2 = arith.constant 0 : i32
    return %arg1, %arg0, %c0_i32, %c0_i32_0, %c0_i32_1 : i32, i32, i32, i32, i32
  }
}

</mosaic_0001>

<bundles_post_ra>
// kernel: tpu_custom_call.1
= control target key start
LH: loop header
LB: loop body
LE: loop exit
PB: predicated region body
PF: predicated region fallthrough
CT: control target
= control target key end

     0   :  { %s4525_s0 = inlined_call_operand.hbm [shape: f32[2,8,32], index: 0, kind: input, shape index: {}]   ;;  %s4526_s1 = inlined_call_operand.vmem [shape: f32[2,1,8], index: 1, kind: input, shape index: {}]   ;;  %s4527_s2 = inlined_call_operand.vmem [shape: f32[2,32,32], index: 2, kind: input, shape index: {}]   ;;  %s4528_s3 = inlined_call_operand.vmem [shape: f32[2,32,32], index: 3, kind: input, shape index: {}]   ;;  %s4529_s4 = inlined_call_operand.vmem [shape: f32[2,32,32], index: 4, kind: input, shape index: {}]   ;;  %s4530_s5 = inlined_call_operand.hbm [shape: f32[2,32,32], index: 5, kind: input, shape index: {}]   ;;  %s4531_s6 = inlined_call_operand.vmem [shape: f32[2,1,32], index: 6, kind: input, shape index: {}]   ;;  %s4532_s7 = inlined_call_operand.vmem [shape: f32[2,1,32], index: 7, kind: input, shape index: {}]   ;;  %s4533_s8 = inlined_call_operand.hbm [shape: f32[2,32,64], index: 8, kind: input, shape index: {}]   ;;  %s4534_s9 = inlined_call_operand.vmem [shape: f32[2,1,64], index: 9, kind: input, shape index: {}]   ;;  %s4535_s10 = inlined_call_operand.vmem [shape: f32[2,64,32], index: 10, kind: input, shape index: {}]   ;;  %s4536_s11 = inlined_call_operand.vmem [shape: f32[2,1,32], index: 11, kind: input, shape index: {}]   ;;  %s4537_s12 = inlined_call_operand.vmem [shape: f32[2,1,32], index: 12, kind: input, shape index: {}]   ;;  %s4538_s13 = inlined_call_operand.vmem [shape: f32[2,1,32], index: 13, kind: input, shape index: {}]   ;;  %s4539_s14 = inlined_call_operand.hbm [shape: f32[2,8,32], index: 14, kind: output, shape index: {0}]   ;;  %s4540_s15 = inlined_call_operand.hbm [shape: f32[2,2,4,8,8], index: 15, kind: output, shape index: {1}]  }
   0x1   :  { %4581 = sst [smem:[#allocation39_spill]] %s4525_s0 }
   0x2   :  { %4582 = sst [smem:[#allocation40_spill]] %s4526_s1 }
   0x3   :  { %4583 = sst [smem:[#allocation41_spill]] %s4527_s2 }
   0x4   :  { %4584 = sst [smem:[#allocation42_spill]] %s4528_s3 }
   0x5   :  { %4585 = sst [smem:[#allocation43_spill]] %s4529_s4 }
   0x6   :  { %4586 = sst [smem:[#allocation44_spill]] %s4530_s5 }
   0x7   :  { %4587 = sst [smem:[#allocation45_spill]] %s4531_s6 }
   0x8   :  { %4588 = sst [smem:[#allocation46_spill]] %s4532_s7 }
   0x9   :  { %4589 = sst [smem:[#allocation47_spill]] %s4533_s8 }
   0xa   :  { %4590 = sst [smem:[#allocation48_spill]] %s4534_s9 }
   0xb   :  { %4591 = sst [smem:[#allocation49_spill]] %s4535_s10 }
   0xc   :  { %4592 = sst [smem:[#allocation50_spill]] %s4536_s11 }
   0xd   :  { %4593 = sst [smem:[#allocation51_spill]] %s4537_s12 }
   0xe   :  { %4594 = sst [smem:[#allocation52_spill]] %s4538_s13 }
   0xf   :  { %4595 = sst [smem:[#allocation53_spill]] %s4539_s14 }
  0x10   :  { %4596 = sst [smem:[#allocation54_spill]] %s4540_s15 }
  0x11   :  { %21 = vsyncpa [#allocation3], 0 }
  0x12   :  { %23 = vsyncpa [#allocation3 + $0x1], 0 }
  0x13   :  { %24 = vsyncpa [#allocation6], 0 }
  0x14   :  { %26 = vsyncpa [#allocation6 + $0x1], 0 }
  0x15   :  { %27 = vsyncpa [#allocation4], 0 }
  0x16   :  { %29 = vsyncpa [#allocation4 + $0x1], 0 }
  0x17   :  { %30 = vsyncpa [#allocation10], 0 }
  0x18   :  { %32 = vsyncpa [#allocation10 + $0x1], 0  ;;  %s3737_s18 = smov 0   ;;  %s3739_s19 = smov 0  }
  0x19   :  { %s3741_s20 = smov 0   ;;  %s3743_s21 = smov 0  }
  0x1a   :  { %s3745_s22 = smov 0   ;;  %s3747_s23 = smov 0  }
  0x1b   :  { %s3749_s24 = smov 0   ;;  %s3751_s25 = smov 0  }
  0x1c   :  { %s3753_s26 = smov 0   ;;  %s3755_s27 = smov 0  }
  0x1d   :  { %s3757_s28 = smov 0   ;;  %s3759_s29 = smov 0  }
  0x1e   :  { %s3761_s30 = smov 0   ;;  %s3763_s16 = smov 0  }
  0x1f LB: > { %4597 = sst [smem:[#allocation15_spill]] %s3583_s18  ;;  %s47_s17 = sadd.s32 1, %s3627_s29  ;;  %s3635_s16 = sphi %s3763_s16, %s38_s16   ;;  %s3631_s30 = sphi %s3761_s30, %s4703_s30   ;;  %s3627_s29 = sphi %s3759_s29, %s4702_s29   ;;  %s3623_s28 = sphi %s3757_s28, %s4701_s28   ;;  %s3619_s27 = sphi %s3755_s27, %s4700_s27   ;;  %s3615_s26 = sphi %s3753_s26, %s4705_s26   ;;  %s3611_s25 = sphi %s3751_s25, %s4698_s25   ;;  %s3607_s24 = sphi %s3749_s24, %s4697_s24   ;;  %s3603_s23 = sphi %s3747_s23, %s4696_s23   ;;  %s3599_s22 = sphi %s3745_s22, %s4695_s22   ;;  %s3595_s21 = sphi %s3743_s21, %s4694_s21   ;;  %s3591_s20 = sphi %s3741_s20, %s4693_s20   ;;  %s3587_s19 = sphi %s3739_s19, %s4692_s19   ;;  %s3583_s18 = sphi %s3737_s18, %s4691_s18  }
  0x20   : > { %4598 = sst [smem:[#allocation16_spill]] %s3587_s19  ;;  %p4545_p0 = scmp.eq.s32.totalorder %s3635_s16, 0 }
  0x21   : > { %4599 = sst [smem:[#allocation17_spill]] %s3591_s20  ;;  %p3809_p1 = scmp.ge.s32.totalorder %s47_s17, 2 }
  0x22   : > { %4600 = sst [smem:[#allocation18_spill]] %s3599_s22  ;;  %p194_p2 = scmp.ne.s32.totalorder %s3603_s23, %s3599_s22 }
  0x23   : > { %4601 = sst [smem:[#allocation19_spill]] %s3603_s23  ;;  %s4707_s17 = smov (%p3809_p1, %s47_s17), 0 }
  0x24   : > { %4602 = sst [smem:[#allocation20_spill]] %s3607_s24  ;;  %p196_p4 = por %p194_p2, %p4545_p0 }
  0x25   : > { %4603 = sst [smem:[#allocation21_spill]] %s3611_s25  ;;  %p4544_p5 = scmp.lt.s32.totalorder %s3635_s16, 4 }
  0x26   : > { %4604 = sst [smem:[#allocation22_spill]] %s3615_s26  ;;  %s534_s13 = sand.u32 1, %s3635_s16  }
  0x27   : > { %4605 = sst [smem:[#allocation23_spill]] %s3619_s27  ;;  %s536_s12 = sand.u32 1, %s3603_s23  }
  0x28   : > { %4606 = sst [smem:[#allocation24_spill]] %s3623_s28  ;;  %s3827_s11 = sshll.u32 %s536_s12, 5 }
  0x29   : > { %4607 = sst [smem:[#allocation25_spill]] %s3627_s29  ;;  %s4543_s10 = sshll.u32 %s3627_s29, 9 }
  0x2a   : > { %4608 = sst [smem:[#allocation26_spill]] %s3631_s30  ;;  %s4612_s5 = sld [smem:[#allocation44_spill]] }
  0x2b   : > { %4609 = sst [smem:[#allocation27_spill]] %s3635_s16  ;;  %s538_s15 = scalar_lea.vmem [#allocation5], %s3827_s11 }
  0x2c   : > { %4611 = sst [smem:[#allocation28_spill]] %s4707_s17  ;;  %s545_s3 = sshll.u32 %s538_s15, 4  ;;  %s3844_s3 = int_to_ptr.vmem [resolvable:$true] %s545_s3 }
  0x2d   : > { %p3840_p6 = pnand %p4544_p5, %p196_p4  ;;  %s3846_s12 = scalar_lea.sflag [#allocation6], %s534_s13 }
  0x2f   : > { %p4554_p8 = pneg %p3840_p6 }
  0x30   : > { %s3835_s4 = scalar_lea.hbm %s4612_s5, %s4543_s10  ;;  %s3368_s10 = scalar_lea.hbm %s4612_s5, 1024 }
  0x31   : > { %s3363_s7 = scalar_lea.hbm %s3835_s4, 512  ;;  %p3369_p11 = scmp.lt.u32.totalorder %s3835_s4, %s4612_s5 }
  0x32   : > { %p3364_p7 = scmp.ne.s32.totalorder %s3835_s4, %s3363_s7  ;;  %p3370_p12 = scmp.lt.u32.totalorder %s3368_s10, %s3363_s7 }
  0x33   : > { %p3372_p2 = scmp.lt.u32.totalorder %s3363_s7, %s3835_s4 }
  0x34   : > { %p3366_p9 = pnand %p4554_p8, %p3364_p7  ;;  %p3371_p13 = por %p3370_p12, %p3369_p11 }
  0x36   : > { %p3367_p10 = pneg %p3366_p9  ;;  %p3373_p4 = por %p3372_p2, %p3371_p13 }
  0x38   : > { %p3374_p5 = pnand %p3373_p4, %p3367_p10 }
  0x3a   : > { %3377 = shalt.err (!%p3374_p5)
}
  0x3b   : > { %s3378_s13 = scalar_lea.vmem %s3844_s3, 512  ;;  %s3637_s9 = smov [#allocation5]  }
  0x3c   : > { %p3379_p7 = scmp.ne.s32.totalorder %s3844_s3, %s3378_s13  ;;  %s3383_s15 = sshll.u32 %s3637_s9, 4  ;;  %s3384_s15 = int_to_ptr.vmem [resolvable:$false] %s3383_s15 }
  0x3d   : > { %s3385_s1 = scalar_lea.vmem %s3384_s15, 1024  ;;  %p3386_p0 = scmp.lt.s32.totalorder %s3844_s3, %s3384_s15 }
  0x3e   : > { %p3381_p9 = pnand %p3379_p7, %p4554_p8  ;;  %p3387_p11 = scmp.lt.s32.totalorder %s3385_s1, %s3378_s13 }
  0x40   : > { %p3382_p3 = pneg %p3381_p9  ;;  %p3388_p12 = por %p3387_p11, %p3386_p0 }
  0x42   : > { %p3389_p13 = pnand %p3388_p12, %p3382_p3 }
  0x44   : > { %3392 = shalt.err (!%p3389_p13)
}
  0x45   : > { %s4546_s6 = smov 128   ;;  %s4547_s10 = smov 8  }
  0x46   : > { %3203 = dma.hbm_to_vmem [thread:$0]  (!%p3840_p6), %s3835_s4, 512, %s3844_s3, %s3846_s12, %s4546_s6, %s4546_s6, %s4547_s10  }
  0x47   : > { %s4614_s7 = sshll.u32 %s3627_s29, 9  ;;  %s4615_s8 = sld [smem:[#allocation47_spill]] }
  0x48   : > { %s571_s1 = scalar_lea.vmem [#allocation7], %s3827_s11  ;;  %p2920_p0 = scmp.ge.s32.totalorder %s3635_s16, 1 }
  0x49   : > { %s578_s5 = sshll.u32 %s571_s1, 4  ;;  %p618_p3 = scmp.lt.s32.totalorder %s3635_s16, 5  ;;  %s3886_s5 = int_to_ptr.vmem [resolvable:$true] %s578_s5 }
  0x4a   : > { %s3894_s4 = sadd.s32 4294967295, %s3635_s16   ;;  %s2909_s11 = sadd.s32 4294967294, %s3635_s16  }
  0x4b   : > { %p3889_p5 = pnand %p2920_p0, %p618_p3  ;;  %s57_s13 = sadd.s32 1, %s3615_s26 }
  0x4c   : > { %p64_p10 = scmp.ne.s32.totalorder %s3615_s26, %s3611_s25  ;;  %p70_p4 = scmp.ne.s32.totalorder %s3611_s25, %s3607_s24 }
  0x4d   : > { %s3882_s15 = scalar_lea.hbm %s4615_s8, %s4614_s7  ;;  %s50_s7 = sadd.s32 1, %s3631_s30 }
  0x4e   : > { %s4616_s3 = scalar_select %p3889_p5, 1, 0 }
  0x4f   : > { %s4709_s7 = smov (!%p3809_p1, %s50_s7), %s3631_s30  ;;  %p4618_p7 = scmp.eq.s32.totalorder %s3635_s16, 0 }
  0x50   : > { %4617 = sst [smem:[#allocation29_spill]] %s4616_s3  ;;  %p52_p2 = scmp.ge.s32.totalorder %s4709_s7, 2 }
  0x51   : > { %p3911_p9 = por %p4618_p7, %p64_p10  ;;  %p71_p11 = scmp.eq.s32.totalorder %s3894_s4, 0 }
  0x52   : > { %s4711_s7 = smov (%p52_p2, %s4709_s7), 0  ;;  %s184_s1 = ssub.s32 %s3627_s29, %s4707_s17 }
  0x53   : > { %4620 = sst [smem:[#allocation30_spill]] %s4711_s7  ;;  %p3921_p1 = por %p71_p11, %p70_p4 }
  0x54   : > { %s54_s6 = ssub.s32 %s3631_s30, %s4711_s7  ;;  %p185_p12 = scmp.eq.s32.totalorder %s184_s1, 0 }
  0x55   : > { %s4621_s14 = scalar_select %p3921_p1, 1, 0 }
  0x56   : > { %p55_p13 = scmp.eq.s32.totalorder %s54_s6, 0  ;;  %p4622_p0 = scmp.ne.s32.totalorder %s3599_s22, %s3595_s21 }
  0x57   : > { %s4624_s27 = sadd.s32 1, %s3603_s23  ;;  %p432_p2 = scmp.eq.s32.totalorder %s3894_s4, 3 }
  0x58   : > { %p3932_p3 = por %p4622_p0, %p71_p11  ;;  %p438_p7 = scmp.eq.s32.totalorder %s2909_s11, 3 }
  0x59   : > { %s3939_s28 = scalar_select %p185_p12, %s3603_s23, %s4624_s27  }
  0x5a   : > { %s4623_s10 = scalar_select %p3932_p3, 1, 0 }
  0x5b   : > { %4625 = sst [smem:[#allocation31_spill]] %s3939_s28  ;;  %s446_s17 = sor.u32 %s184_s1, %s54_s6 }
  0x5c   : > { %s3942_s3 = scalar_select %p55_p13, %s3615_s26, %s57_s13  }
  0x5d   : > { %s449_s29 = sadd.s32 1, %s3591_s20  ;;  %p3949_p8 = por %p432_p2, %p64_p10 }
  0x5e   : > { %4626 = sst [smem:[#allocation32_spill]] %s3942_s3  ;;  %p3956_p11 = por %p438_p7, %p70_p4 }
  0x5f   : > { %s4627_s21 = scalar_select %p3949_p8, 1, 0 }
  0x60   : > { %s4629_s7 = scalar_select %p3956_p11, 1, 0 }
  0x61   : > { %4628 = sst [smem:[#allocation33_spill]] %s4627_s21  ;;  %p447_p12 = scmp.eq.s32.totalorder %s446_s17, 0 }
  0x62   : > { %4630 = sst [smem:[#allocation34_spill]] %s4629_s7  ;;  %p459_p13 = scmp.ne.s32.totalorder %s3591_s20, %s3587_s19 }
  0x63   : > { %p465_p0 = scmp.ne.s32.totalorder %s3587_s19, %s3583_s18  ;;  %s4560_s27 = sand.u32 1, %s3615_s26  }
  0x64   : > { %s3966_s6 = scalar_select %p447_p12, %s3591_s20, %s449_s29  }
  0x65   : > { %p3968_p3 = por %p459_p13, %p432_p2  ;;  %p3972_p10 = por %p465_p0, %p438_p7 }
  0x66   : > { %4631 = sst [smem:[#allocation35_spill]] %s3966_s6  ;;  %s2912_s1 = sshll.u32 %s4560_s27, 3 }
  0x67   : > { %s4632_s11 = scalar_select %p3968_p3, 1, 0 }
  0x68   : > { %s4634_s13 = scalar_select %p3972_p10, 1, 0 }
  0x69   : > { %4633 = sst [smem:[#allocation36_spill]] %s4632_s11  ;;  %s2913_s3 = sshll.u32 %s3631_s30, 7 }
  0x6a   : > { %4635 = sst [smem:[#allocation37_spill]] %s4634_s13  ;;  %s4636_s0 = sld [smem:[#allocation39_spill]] }
  0x6b   : > { %s490_s18 = scalar_lea.vmem [#allocation2], %s2912_s1  ;;  %p4637_p4 = scmp.lt.s32.totalorder %s3635_s16, 4 }
  0x6c   : > { %s497_s29 = sshll.u32 %s490_s18, 4  ;;  %s3393_s20 = scalar_lea.hbm %s3882_s15, 512  ;;  %s3984_s29 = int_to_ptr.vmem [resolvable:$true] %s497_s29 }
  0x6d   : > { %p3990_p2 = pnand %p4637_p4, %p3911_p9  ;;  %p3394_p7 = scmp.ne.s32.totalorder %s3882_s15, %s3393_s20 }
  0x6e   : > { %p4639_p12 = pneg %p3840_p6  ;;  %p3399_p10 = scmp.lt.u32.totalorder %s3882_s15, %s4615_s8 }
  0x6f   : > { %p3402_p9 = scmp.lt.u32.totalorder %s3393_s20, %s3882_s15 }
  0x70   : > { %s3982_s23 = scalar_lea.hbm %s4636_s0, %s2913_s3  ;;  %p3396_p13 = pnand %p3394_p7, %p4639_p12 }
  0x71   : > { %s3398_s3 = scalar_lea.hbm %s4615_s8, 1024 }
  0x72   : > { %p3397_p0 = pneg %p3396_p13  ;;  %p3400_p11 = scmp.lt.u32.totalorder %s3398_s3, %s3393_s20 }
  0x74   : > { %p3401_p8 = por %p3400_p11, %p3399_p10 }
  0x76   : > { %p3403_p4 = por %p3402_p9, %p3401_p8 }
  0x78   : > { %p3404_p3 = pnand %p3403_p4, %p3397_p0 }
  0x7a   : > { %3407 = shalt.err (!%p3404_p3)
}
  0x7b   : > { %s3408_s9 = scalar_lea.vmem %s3886_s5, 512  ;;  %s3640_s27 = smov [#allocation7]  }
  0x7c   : > { %p3409_p7 = scmp.ne.s32.totalorder %s3886_s5, %s3408_s9  ;;  %s3413_s17 = sshll.u32 %s3640_s27, 4  ;;  %s3414_s17 = int_to_ptr.vmem [resolvable:$false] %s3413_s17 }
  0x7d   : > { %s3415_s28 = scalar_lea.vmem %s3414_s17, 1024  ;;  %p3416_p5 = scmp.lt.s32.totalorder %s3886_s5, %s3414_s17 }
  0x7e   : > { %p3411_p13 = pnand %p3409_p7, %p4639_p12  ;;  %p3417_p11 = scmp.lt.s32.totalorder %s3415_s28, %s3408_s9 }
  0x80   : > { %p3412_p1 = pneg %p3411_p13  ;;  %p3418_p10 = por %p3417_p11, %p3416_p5 }
  0x82   : > { %p3419_p8 = pnand %p3418_p10, %p3412_p1 }
  0x84   : > { %3422 = shalt.err (!%p3419_p8)
}
  0x85   : > { %s4640_s20 = smov 8   ;;  %s4641_s3 = smov 128  }
  0x86   : > { %3206 = dma.hbm_to_vmem [thread:$0]  (!%p3840_p6), %s3882_s15, 512, %s3886_s5, %s3846_s12, %s4641_s3, %s4641_s3, %s4640_s20  }
  0x87   : > { %s4642_s1 = sand.u32 1, %s3615_s26   ;;  %s3423_s9 = scalar_lea.hbm %s3982_s23, 128 }
  0x88   : > { %s487_s18 = scalar_lea.sflag [#allocation3], %s4642_s1  ;;  %p3424_p5 = scmp.ne.s32.totalorder %s3982_s23, %s3423_s9 }
  0x89   : > { %p3425_p1 = pneg %p3990_p2  ;;  %s3428_s17 = scalar_lea.hbm %s4636_s0, 256 }
  0x8a   : > { %p3429_p9 = scmp.lt.u32.totalorder %s3982_s23, %s4636_s0  ;;  %p3430_p4 = scmp.lt.u32.totalorder %s3428_s17, %s3423_s9 }
  0x8b   : > { %p3426_p3 = pnand %p3425_p1, %p3424_p5  ;;  %p3432_p7 = scmp.lt.u32.totalorder %s3423_s9, %s3982_s23 }
  0x8c   : > { %p3431_p6 = por %p3430_p4, %p3429_p9 }
  0x8d   : > { %p3427_p0 = pneg %p3426_p3 }
  0x8e   : > { %p3433_p12 = por %p3432_p7, %p3431_p6 }
  0x90   : > { %p3434_p13 = pnand %p3433_p12, %p3427_p0 }
  0x92   : > { %3437 = shalt.err (!%p3434_p13)
}
  0x93   : > { %s3438_s5 = scalar_lea.vmem %s3984_s29, 128  ;;  %s3641_s12 = smov [#allocation2]  }
  0x94   : > { %p3439_p11 = scmp.ne.s32.totalorder %s3984_s29, %s3438_s5  ;;  %s3443_s15 = sshll.u32 %s3641_s12, 4  ;;  %s3444_s15 = int_to_ptr.vmem [resolvable:$false] %s3443_s15 }
  0x95   : > { %s3445_s8 = scalar_lea.vmem %s3444_s15, 256  ;;  %p3446_p5 = scmp.lt.s32.totalorder %s3984_s29, %s3444_s15 }
  0x96   : > { %p3441_p10 = pnand %p3439_p11, %p3425_p1  ;;  %p3447_p3 = scmp.lt.s32.totalorder %s3445_s8, %s3438_s5 }
  0x98   : > { %p3442_p8 = pneg %p3441_p10  ;;  %p3448_p9 = por %p3447_p3, %p3446_p5 }
  0x9a   : > { %p3449_p4 = pnand %p3448_p9, %p3442_p8 }
  0x9c   : > { %3452 = shalt.err (!%p3449_p4)
}
  0x9d   : > { %3200 = dma.hbm_to_vmem [thread:$0]  (!%p3990_p2), %s3982_s23, 128, %s3984_s29, %s487_s18  }
  0x9e   : > { %s4643_s20 = sld [smem:[#allocation29_spill]] }
  0xa4   : > { %p4644_p0 = scmp.ne.s32.totalorder %s4643_s20, 0 }
  0xa6   : > { %622 = sbr.rel (%p4644_p0) target bundleno = 2767 (0xacf), region = 76 }
  0xad   : > { %s4051_s3 = sand.u32 1, %s3611_s25   ;;  %p4645_p1 = scmp.ne.s32.totalorder %s4621_s14, 0 }
  0xae   : > { %s4565_s1 = sshll.u32 %s4051_s3, 3  ;;  %s625_s9 = scalar_lea.sflag [#allocation3], %s4051_s3 }
  0xaf   : > { %s4057_s2 = scalar_lea.vmem [#allocation2], %s4565_s1 }
  0xb0   : > { %3566 = dma.done.wait (%p4645_p1), %s625_s9, 128  }
  0xb1   : > { %3568 = vsyncadd (%p4645_p1), %s625_s9, 4294967168  ;;  %s633_s23 = sand.u32 1, %s3894_s4   ;;  %s635_s6 = sand.u32 1, %s3599_s22  }
  0xb2   : > { %s2922_s29 = sshll.u32 %s635_s6, 5  ;;  %s634_s18 = scalar_lea.sflag [#allocation6], %s633_s23 }
  0xb3   : > { %s4065_s27 = scalar_lea.vmem [#allocation5], %s2922_s29  ;;  %p4647_p2 = scmp.ne.s32.totalorder %s4623_s10, 0 }
  0xb4   : > { %4646 = sst [smem:[#allocation38_spill]] %s4065_s27 }
  0xb5   : > { %3570 = dma.done.wait (%p4647_p2), %s634_s18, 1024  }
  0xb6   : > { %3572 = vsyncadd (%p4647_p2), %s634_s18, 4294966272  ;;  %s4648_s17 = sld [smem:[#allocation24_spill]]  ;;  %s4649_s28 = sld [smem:[#allocation23_spill]] }
  0xb7   : > { %s4564_s14 = sand.u32 1, %s3587_s19   ;;  %s4652_s0 = sld [smem:[#allocation41_spill]] }
  0xb8   : > { %s2925_s4 = sshll.u32 %s4564_s14, 5  ;;  %s4653_s10 = sld [smem:[#allocation42_spill]] }
  0xb9   : > { %s4654_s7 = sld [smem:[#allocation43_spill]]  ;;  %s4656_s6 = sld [smem:[#allocation48_spill]] }
  0xba   : > { %s4657_s11 = sld [smem:[#allocation49_spill]]  ;;  %s4658_s19 = sld [smem:[#allocation50_spill]] }
  0xbb   : > { %s4660_s15 = sld [smem:[#allocation52_spill]]  ;;  %s4130_s9 = scalar_lea.vmem [#allocation7], %s2922_s29 }
  0xbc   : > { %p749_p6 = scmp.lt.s32.totalorder %s4648_s17, 1  ;;  %p752_p7 = scmp.lt.s32.totalorder %s4649_s28, 1 }
  0xbd   : > { %s4661_s23 = sshll.u32 %s4051_s3, 3  ;;  %p2934_p12 = scmp.ne.s32.totalorder %s4649_s28, 0 }
  0xbe   : > { %s4713_s17 = smov (!%p749_p6, %s4648_s17), 1  ;;  %v794_v0 = vld [vmem:[%s4057_s2] sm:$0xff] (!%p2934_p12)  ;;  %vm795_vm0 = vcmask (!%p2934_p12), 261120  }
  0xbf   : > { %s4080_s5 = scalar_select %p752_p7, %s4649_s28, 1 }
  0xc1   : > { %s2977_s20 = sshll.u32 %s4080_s5, 5  ;;  %s775_s18 = scalar_lea.vmem %s4656_s6, %s4080_s5 }
  0xc2   : > { %s756_s30 = scalar_lea.vmem %s4652_s0, %s2977_s20  ;;  %s4097_s25 = scalar_lea.vmem %s4653_s10, %s2977_s20 }
  0xc3   : > { %s4102_s24 = scalar_lea.vmem %s4654_s7, %s2977_s20  ;;  %s2980_s1 = sshll.u32 %s4080_s5, 6 }
  0xc4   : > { %s4116_s26 = scalar_lea.vmem %s4657_s11, %s2980_s1  ;;  %s783_s22 = scalar_lea.vmem %s4658_s19, %s4080_s5 }
  0xc5   : > { %s4659_s20 = sld [smem:[#allocation51_spill]]  ;;  %s789_s21 = scalar_lea.vmem %s4660_s15, %s4080_s5 }
  0xc6   : > { %s4134_s6 = scalar_lea.vmem [#allocation8], %s4661_s23  ;;  %s4136_s0 = scalar_lea.vmem [#allocation9], %s2925_s4 }
  0xc7   : > { %793 = sbr.rel (%p2934_p12) target bundleno = 206 (0xce), region = 92  ;;  %796 = vst.msk [vmem:[%s4134_s6] sm:$0xff] (!%p2934_p12), %vm795_vm0, %v794_v0 }
  0xcb   : > { %s786_s27 = scalar_lea.vmem %s4659_s20, %s4080_s5 }
  0xce PF: > { %v798_v1 = vld [vmem:[%s756_s30] sm:$0xff]  ;;  %v799_v2 = vld [vmem:[%s756_s30 + $0x8] sm:$0xff]  ;;  %v800_v3 = vld [vmem:[%s756_s30 + $0x10] sm:$0xff]  ;;  %v3642_v4 = vmov 0.0|0.0   ;;  %vm3643_vm1 = vmmov 0   ;;  %v3644_v7 = vmov 0.0   ;;  %v1039_v28 = vlaneseq }
  0xcf   : > { %3145 = vmatprep.subr.bf16.mxu1 %v3642_v4  ;;  %v3146_v5 = vpack.c.bf16 %v799_v2, %v798_v1  ;;  %v801_v6 = vld [vmem:[%s756_s30 + $0x18] sm:$0xff]  ;;  %3039 = vmatprep.mubr.msk.f32.mxu1 %vm3643_vm1, %v3644_v7  ;;  %v876_v9 = vld [vmem:[%s4097_s25] sm:$0xff]  ;;  %v877_v10 = vld [vmem:[%s4097_s25 + $0x8] sm:$0xff]  ;;  %vm802_vm2 = vcmask 261120   ;;  %s3645_s19 = smov 120   ;;  %s3647_s30 = smov 112  }
  0xd0   : > { %3157 = vmatprep.subr.bf16.mxu0 %v3642_v4  ;;  %3061 = vmatprep.mubr.msk.f32.mxu0 %vm3643_vm1, %v3644_v7  ;;  %v3149_v8 = vpack.c.bf16 %v801_v6, %v800_v3  ;;  %v4151_v11 = vld [vmem:[%s4134_s6] sm:$0xff]  ;;  %v3152_v12 = vpack.c.bf16 %v877_v10, %v876_v9  ;;  %v950_v18 = vld [vmem:[%s4102_s24] sm:$0xff]  ;;  %v951_v19 = vld [vmem:[%s4102_s24 + $0x8] sm:$0xff]  ;;  %v3648_v26 = vmov 1983009808   ;;  %v4187_v33 = vshrl.u32 %v1039_v28, 7 }
  0xd1   : > { %3147 = vmatpush3.bf16.msra.mxu1 %v3146_v5  ;;  %v878_v13 = vld [vmem:[%s4097_s25 + $0x10] sm:$0xff]  ;;  %v879_v14 = vld [vmem:[%s4097_s25 + $0x18] sm:$0xff]  ;;  %v3158_v20 = vpack.c.bf16 %v951_v19, %v950_v18  ;;  %s3646_s25 = smov 104   ;;  %v1037_v27 = vunpack.c.l.s4 %v3648_v26  ;;  %v3649_v30 = vmov 1934713408   ;;  %vm1462_vm3 = vcmask 64512  }
  0xd2   : > { %3148 = vmatprep.subr.bf16.mxu1 %v3642_v4  ;;  %v3155_v15 = vpack.c.bf16 %v879_v14, %v878_v13  ;;  %v952_v21 = vld [vmem:[%s4102_s24 + $0x10] sm:$0xff]  ;;  %v953_v22 = vld [vmem:[%s4102_s24 + $0x18] sm:$0xff]  ;;  %v1069_v31 = vunpack.c.l.s4 %v3649_v30  ;;  %s4662_s2 = sld [smem:[#allocation40_spill]]  ;;  %s3651_s28 = smov 16   ;;  %vm2284_vm6 = vcmask 130048   ;;  %vm2286_vm7 = vcmask 195584  }
  0xd3   : > { %3159 = vmatpush3.bf16.msra.mxu0 %v3158_v20  ;;  %v3161_v24 = vpack.c.bf16 %v953_v22, %v952_v21  ;;  %v1038_v32 = vunpack.c.0.s8 %v1037_v27  ;;  %s3652_s4 = smov 8   ;;  %s3653_s1 = smov 24   ;;  %vm2496_vm8 = vcmask 523264  }
  0xd4   : > { %3160 = vmatprep.subr.bf16.mxu0 %v3642_v4  ;;  %v1070_v36 = vunpack.c.0.s8 %v1069_v31  ;;  %s4665_s10 = sld [smem:[#allocation45_spill]]  ;;  %s4667_s8 = sld [smem:[#allocation46_spill]] }
  0xd5   : > { %3150 = vmatpush3.bf16.msra.mxu1 %v3149_v8  ;;  %v4190_v37 = vsub.s32 %v1038_v32, %v4187_v33  ;;  %s4675_s12 = sld [smem:[#allocation54_spill]] }
  0xd6   : > { %3151 = vmatprep.subr.bf16.mxu1 %v3642_v4  ;;  %v4193_v44 = vsub.s32 %v1070_v36, %v4187_v33 }
  0xd7   : > { %3162 = vmatpush3.bf16.msra.mxu0 %v3161_v24 }
  0xd8   : > { %3040 = vmatmul.mubr.msk.f32.vlgmr.msra.gmra.mrb[0].mxu1 %vm802_vm2, %v4151_v11  ;;  %3074 = vmatprep.subr.mxu0 %v3644_v7  ;;  %s4663_s29 = scalar_lea.vmem %s4662_s2, %s4713_s17  ;;  %s4664_s17 = sld [smem:[#allocation38_spill]] }
  0xd9   : > { %3153 = vmatpush3.bf16.msra.mxu1 %v3152_v12  ;;  %3050 = vmatprep.mubr.msk.f32.mxu1 %vm3643_vm1, %v3644_v7 }
  0xda   : > { %3154 = vmatprep.subr.bf16.mxu1 %v3642_v4  ;;  %3062 = vmatmul.mubr.msk.f32.vlgmr.msra.gmra.mrb[0].mxu0 %vm802_vm2, %v4151_v11  ;;  %s4666_s7 = scalar_lea.vmem %s4665_s10, %s4080_s5  ;;  %s4668_s16 = scalar_lea.vmem %s4667_s8, %s4080_s5 }
  0xdb   : > { %3076 = vmatprep.mubr.msk.f32.mxu0 %vm3643_vm1, %v3644_v7  ;;  %s3654_s8 = smov [#allocation9]  }
  0xdd   : > { %3156 = vmatpush3.bf16.msra.mxu1 %v3155_v15 }
  0xde   : > { %3064 = vmatprep.subr.mxu1 %v3644_v7 }
  0xe0   : > { %3051 = vmatmul.mubr.msk.f32.vlgmr.msra.gmra.mrb[2].mxu1 %vm802_vm2, %v4151_v11 }
  0xe1   : > { %3066 = vmatprep.mubr.msk.f32.mxu1 %vm3643_vm1, %v3644_v7 }
 0x1ab   : > { %v4166_v16 = vpop.f32.mrb[0].mxu1 }
 0x1ac   : > { %v3041_v17 = vpop.f32.mrb[1].mxu1  ;;  %1025 = vrot.lane.b32.xlu1 %v4166_v16, %s3645_s19 }
 0x1b3   : > { %v946_v23 = vpop.f32.mrb[2].mxu1 }
 0x1b4   : > { %1177 = vrot.lane.b32.xlu1 %v946_v23, %s3646_s25  ;;  %1171 = vrot.lane.b32.xlu0 %v946_v23, %s3645_s19  ;;  %v3052_v25 = vpop.f32.mrb[3].mxu1 }
 0x1b8   : > { %1031 = vrot.lane.b32.xlu1 %v4166_v16, %s3646_s25  ;;  %1174 = vrot.lane.b32.xlu0 %v946_v23, %s3647_s30 }
 0x1bc   : > { %1028 = vrot.lane.b32.xlu0 %v4166_v16, %s3647_s30 }
 0x21e   : > { %v1026_v29 = vpop.permute.xlu1 %1025 }
 0x226   : > { %v1178_v34 = vpop.permute.xlu1 %1177  ;;  %v1172_v35 = vpop.permute.xlu0 %1171 }
 0x227   : > { %v1196_v38 = vcombine.low %v1172_v35, %v1178_v34  ;;  %v1197_v39 = vcombine.high %v1172_v35, %v1178_v34 }
 0x229   : > { %v1204_v45 = vrot.slane %v1196_v38, %v4190_v37  ;;  %v1211_v46 = vrot.slane %v1197_v39, %v4190_v37 }
 0x22a   : > { %v1175_v40 = vpop.permute.xlu0 %1174  ;;  %v1032_v41 = vpop.permute.xlu1 %1031 }
 0x22b   : > { %v1180_v42 = vcombine.low %v946_v23, %v1175_v40  ;;  %v1181_v43 = vcombine.high %v946_v23, %v1175_v40  ;;  %v1050_v49 = vcombine.low %v1026_v29, %v1032_v41  ;;  %v1051_v50 = vcombine.high %v1026_v29, %v1032_v41 }
 0x22d   : > { %v1188_v47 = vrot.slane %v1180_v42, %v4190_v37  ;;  %v1195_v48 = vrot.slane %v1181_v43, %v4190_v37  ;;  %v1058_v62 = vrot.slane %v1050_v49, %v4190_v37  ;;  %v1065_v63 = vrot.slane %v1051_v50, %v4190_v37 }
 0x22e   : > { %v1029_v51 = vpop.permute.xlu0 %1028 }
 0x22f   : > { %v1212_v52 = vcombine.low %v1188_v47, %v1204_v45  ;;  %v1213_v53 = vcombine.high %v1188_v47, %v1204_v45  ;;  %v1228_v54 = vcombine.low %v1195_v48, %v1211_v46  ;;  %v1229_v55 = vcombine.high %v1195_v48, %v1211_v46 }
 0x230   : > { %v1034_v56 = vcombine.low %v4166_v16, %v1029_v51  ;;  %v1035_v57 = vcombine.high %v4166_v16, %v1029_v51 }
 0x231   : > { %v1220_v58 = vrot.slane %v1212_v52, %v4193_v44  ;;  %v1227_v59 = vrot.slane %v1213_v53, %v4193_v44  ;;  %v1236_v60 = vrot.slane %v1228_v54, %v4193_v44  ;;  %v1243_v61 = vrot.slane %v1229_v55, %v4193_v44 }
 0x232   : > { %v1042_v0 = vrot.slane %v1034_v56, %v4190_v37  ;;  %v1049_v1 = vrot.slane %v1035_v57, %v4190_v37  ;;  %v4249_v56 = vpop.f32.mrb[0].mxu0 }
 0x233   : > { %v1248_v2 = vcombine.low %v1220_v58, %v1227_v59  ;;  %v2940_v3 = vcombine.high %v1220_v58, %v1227_v59  ;;  %v1264_v5 = vcombine.low %v1236_v60, %v1243_v61  ;;  %v2941_v6 = vcombine.high %v1236_v60, %v1243_v61  ;;  %v3063_v57 = vpop.f32.mrb[1].mxu0  ;;  %v1771_v58 = vld [vmem:[%s4663_s29] sm:$0x1] }
 0x234   : > { %v1066_v8 = vcombine.low %v1042_v0, %v1058_v62  ;;  %v1067_v9 = vcombine.high %v1042_v0, %v1058_v62  ;;  %v1082_v10 = vcombine.low %v1049_v1, %v1065_v63  ;;  %v1083_v12 = vcombine.high %v1049_v1, %v1065_v63 }
 0x235   : > { %v1255_v13 = vrot.slane %v1248_v2, %v4190_v37  ;;  %v1263_v14 = vrot.slane %v2940_v3, %v4190_v37  ;;  %v1271_v15 = vrot.slane %v1264_v5, %v4190_v37  ;;  %v1279_v16 = vrot.slane %v2941_v6, %v4190_v37 }
 0x236   : > { %v1074_v17 = vrot.slane %v1066_v8, %v4193_v44  ;;  %v1081_v18 = vrot.slane %v1067_v9, %v4193_v44  ;;  %v1090_v19 = vrot.slane %v1082_v10, %v4193_v44  ;;  %v1097_v20 = vrot.slane %v1083_v12, %v4193_v44 }
 0x237   : > { %v1280_v21 = vcombine.low %v1255_v13, %v1263_v14  ;;  %v1281_v22 = vcombine.high %v1255_v13, %v1263_v14  ;;  %v1296_v23 = vcombine.low %v1271_v15, %v1279_v16  ;;  %v1297_v24 = vcombine.high %v1271_v15, %v1279_v16 }
 0x238   : > { %v1102_v25 = vcombine.low %v1074_v17, %v1081_v18  ;;  %v2938_v26 = vcombine.high %v1074_v17, %v1081_v18  ;;  %v1118_v27 = vcombine.low %v1090_v19, %v1097_v20  ;;  %v2939_v28 = vcombine.high %v1090_v19, %v1097_v20 }
 0x239   : > { %v1288_v29 = vrot.slane %v1280_v21, %v4193_v44  ;;  %v1304_v30 = vrot.slane %v1296_v23, %v4193_v44  ;;  %v1295_v31 = vrot.slane %v1281_v22, %v4193_v44  ;;  %v1311_v32 = vrot.slane %v1297_v24, %v4193_v44 }
 0x23a   : > { %v1109_v34 = vrot.slane %v1102_v25, %v4190_v37  ;;  %v1117_v35 = vrot.slane %v2938_v26, %v4190_v37  ;;  %v1125_v36 = vrot.slane %v1118_v27, %v4190_v37  ;;  %v1133_v38 = vrot.slane %v2939_v28, %v4190_v37 }
 0x23b   : > { %v1312_v39 = vcombine.low %v1288_v29, %v1304_v30  ;;  %v1314_v40 = vcombine.low %v1295_v31, %v1311_v32  ;;  %v1313_v52 = vcombine.high %v1288_v29, %v1304_v30  ;;  %v1315_v54 = vcombine.high %v1295_v31, %v1311_v32 }
 0x23c   : > { %v1134_v41 = vcombine.low %v1109_v34, %v1117_v35  ;;  %v1135_v42 = vcombine.high %v1109_v34, %v1117_v35  ;;  %v1150_v43 = vcombine.low %v1125_v36, %v1133_v38  ;;  %v1151_v45 = vcombine.high %v1125_v36, %v1133_v38 }
 0x23d   : > { %3065 = vmatpush3.xpose.msk.msra.mxu1 %vm1462_vm3, %v1312_v39  ;;  %3075 = vmatpush3.xpose.msk.msra.mxu0 %vm1462_vm3, %v1314_v40  ;;  %vm1772_vm4 = vcmp.gt.f32.partialorder %v1771_v58, 0.5  ;;  %v1776_v59 = vsub.s32 0, %v4187_v33  ;;  %v3650_v60 = vmov 0  }
 0x23e   : > { %3069 = vmatprep.subr.mxu1 %v3644_v7  ;;  %v1142_v46 = vrot.slane %v1134_v41, %v4193_v44  ;;  %v1158_v47 = vrot.slane %v1150_v43, %v4193_v44  ;;  %v1149_v48 = vrot.slane %v1135_v42, %v4193_v44  ;;  %v1165_v49 = vrot.slane %v1151_v45, %v4193_v44 }
 0x23f   : > { %3084 = vmatprep.subr.mxu0 %v3644_v7  ;;  %v1773_v61 = vsel %vm1772_vm4, 1, %v3650_v60 }
 0x240   : > { %v1166_v50 = vcombine.low %v1142_v46, %v1158_v47  ;;  %v1168_v51 = vcombine.low %v1149_v48, %v1165_v49  ;;  %v1167_v53 = vcombine.high %v1142_v46, %v1158_v47  ;;  %v1169_v55 = vcombine.high %v1149_v48, %v1165_v49 }
 0x241   : > { %v1777_v62 = vrot.slane %v1773_v61, %v1776_v59 }
 0x242   : > { %3067 = vmatmul.mubr.msk.f32.vlgmr.msra.gmra.mrb[4].mxu1 %vm1462_vm3, %v1166_v50  ;;  %3077 = vmatmul.mubr.msk.f32.vlgmr.msra.gmra.mrb[2].mxu0 %vm1462_vm3, %v1168_v51 }
 0x243   : > { %3070 = vmatpush3.xpose.msk.msra.mxu1 %vm1462_vm3, %v1313_v52  ;;  %3071 = vmatprep.mubr.msk.f32.mxu1 %vm3643_vm1, %v3644_v7  ;;  %vm1778_vm5 = vcmp.eq.s32.totalorder %v1777_v62, 1 }
 0x244   : > { %3079 = vmatprep.subr.mxu1 %v3644_v7  ;;  %3086 = vmatprep.mubr.msk.f32.mxu0 %vm3643_vm1, %v3644_v7 }
 0x246   : > { %3072 = vmatmul.mubr.msk.f32.vlgmr.msra.gmra.mrb[6].mxu1 %vm1462_vm3, %v1167_v53 }
 0x247   : > { %3080 = vmatpush3.xpose.msk.msra.mxu1 %vm1462_vm3, %v1315_v54  ;;  %3081 = vmatprep.mubr.msk.f32.mxu1 %vm3643_vm1, %v3644_v7 }
 0x248   : > { %3089 = vmatprep.subr.mxu1 %v3644_v7 }
 0x24a   : > { %3082 = vmatmul.mubr.msk.f32.vlgmr.msra.gmra.mrb[8].mxu1 %vm1462_vm3, %v1169_v55 }
 0x24b   : > { %3091 = vmatprep.mubr.msk.f32.mxu1 %vm3643_vm1, %v3644_v7 }
 0x315   : > { %v1535_v63 = vpop.f32.mrb[4].mxu1  ;;  %v1687_v0 = vpop.f32.mrb[2].mxu0 }
 0x316   : > { %v1767_v1 = vmul.f32 0.35355338, %v1535_v63  ;;  %v1769_v2 = vmul.f32 0.35355338, %v1687_v0  ;;  %v3068_v3 = vpop.f32.mrb[5].mxu1  ;;  %v3078_v5 = vpop.f32.mrb[3].mxu0 }
 0x318   : > { %v1779_v6 = vsel %vm1778_vm5, -1e+09, %v1767_v1  ;;  %v1781_v33 = vsel %vm1778_vm5, -1e+09, %v1769_v2 }
 0x319   : > { %v1611_v8 = vpop.f32.mrb[6].mxu1  ;;  %v1783_v9 = vsel %vm1462_vm3, %v1779_v6, -inf  ;;  %v1789_v15 = vsel %vm1462_vm3, %v1781_v33, -inf }
 0x31a   : > { %v1768_v10 = vmul.f32 0.35355338, %v1611_v8  ;;  %1784 = vmax.xlane.f32.xlu0 %v1783_v9  ;;  %v3073_v12 = vpop.f32.mrb[7].mxu1 }
 0x31c   : > { %v1780_v13 = vsel %vm1778_vm5, -1e+09, %v1768_v10 }
 0x31d   : > { %v1763_v14 = vpop.f32.mrb[8].mxu1  ;;  %v1786_v16 = vsel %vm1462_vm3, %v1780_v13, -inf }
 0x31e   : > { %v1770_v17 = vmul.f32 0.35355338, %v1763_v14  ;;  %1790 = vmax.xlane.f32.xlu0 %v1789_v15  ;;  %1787 = vmax.xlane.f32.xlu1 %v1786_v16  ;;  %v3083_v18 = vpop.f32.mrb[9].mxu1 }
 0x320   : > { %v1782_v19 = vsel %vm1778_vm5, -1e+09, %v1770_v17 }
 0x321   : > { %v1792_v20 = vsel %vm1462_vm3, %v1782_v19, -inf }
 0x322   : > { %1793 = vmax.xlane.f32.xlu0 %v1792_v20 }
 0x32f   : > { %1317 = vrot.lane.b32.xlu1 %v4249_v56, %s3645_s19  ;;  %s4670_s19 = sld [smem:[#allocation24_spill]] }
 0x335   : > { %s2970_s2 = sshll.u32 %s4670_s19, 2 }
 0x3a7   : > { %v1785_v21 = vpop.xlane.xlu0 %1784 }
 0x3a8   : > { %v1795_v22 = vsub.f32 %v1779_v6, %v1785_v21 }
 0x3aa   : > { %v1799_v23 = vmul.f32 1.442695, %v1795_v22 }
 0x3ab   : > { %v1791_v24 = vpop.xlane.xlu0 %1790  ;;  %v1788_v25 = vpop.xlane.xlu1 %1787 }
 0x3ac   : > { %3343 = vpow2.f32 %v1799_v23  ;;  %v1797_v26 = vsub.f32 %v1781_v33, %v1791_v24  ;;  %v1796_v27 = vsub.f32 %v1780_v13, %v1788_v25 }
 0x3ae   : > { %v1803_v28 = vmul.f32 1.442695, %v1797_v26  ;;  %v1801_v29 = vmul.f32 1.442695, %v1796_v27 }
 0x3af   : > { %v1794_v30 = vpop.xlane.xlu0 %1793  ;;  %v1318_v43 = vpop.permute.xlu1 %1317 }
 0x3b0   : > { %3345 = vpow2.f32 %v1803_v28  ;;  %v1798_v31 = vsub.f32 %v1782_v19, %v1794_v30 }
 0x3b1   : > { %3347 = vpow2.f32 %v1801_v29 }
 0x3b2   : > { %v1805_v32 = vmul.f32 1.442695, %v1798_v31 }
 0x3b4   : > { %3349 = vpow2.f32 %v1805_v32 }
 0x3b6   : > { %v3344_v34 = vpop.eup %3343 }
 0x3b7   : > { %v1807_v35 = vsel %vm1462_vm3, %v3344_v34, 0.0 }
 0x3b8   : > { %1808 = vadd.xlane.f32.xlu1 %v1807_v35 }
 0x3ba   : > { %v3346_v36 = vpop.eup %3345 }
 0x3bb   : > { %v3348_v38 = vpop.eup %3347  ;;  %v1813_v39 = vsel %vm1462_vm3, %v3346_v36, 0.0 }
 0x3bc   : > { %1814 = vadd.xlane.f32.xlu1 %v1813_v39  ;;  %v1810_v40 = vsel %vm1462_vm3, %v3348_v38, 0.0 }
 0x3bd   : > { %1811 = vadd.xlane.f32.xlu0 %v1810_v40 }
 0x3be   : > { %v4270_v41 = vpop.eup %3349 }
 0x3bf   : > { %v1816_v42 = vsel %vm1462_vm3, %v4270_v41, 0.0 }
 0x3c1   : > { %1817 = vadd.xlane.f32.xlu0 %v1816_v42 }
 0x3cd   : > { %1323 = vrot.lane.b32.xlu1 %v4249_v56, %s3646_s25  ;;  %s4671_s25 = sld [smem:[#allocation23_spill]] }
 0x3d3   : > { %s2971_s29 = sshll.u32 %s4671_s25, 3 }
 0x3d7   : > { %1320 = vrot.lane.b32.xlu0 %v4249_v56, %s3647_s30 }
 0x445   : > { %v1809_v45 = vpop.xlane.xlu1 %1808 }
 0x446   : > { %3351 = vrcp.f32 %v1809_v45 }
 0x449   : > { %v1815_v46 = vpop.xlane.xlu1 %1814 }
 0x44a   : > { %3353 = vrcp.f32 %v1815_v46  ;;  %v1812_v47 = vpop.xlane.xlu0 %1811 }
 0x44b   : > { %3355 = vrcp.f32 %v1812_v47 }
 0x44d   : > { %v1324_v48 = vpop.permute.xlu1 %1323 }
 0x44e   : > { %v1818_v49 = vpop.xlane.xlu0 %1817  ;;  %v1342_v51 = vcombine.low %v1318_v43, %v1324_v48  ;;  %v1343_v53 = vcombine.high %v1318_v43, %v1324_v48  ;;  %v2288_v48 = vld [vmem:[%s4664_s17] sm:$0xff] }
 0x44f   : > { %3357 = vrcp.f32 %v1818_v49 }
 0x450   : > { %v3352_v50 = vpop.eup %3351  ;;  %v1350_v60 = vrot.slane %v1342_v51, %v4190_v37  ;;  %v1357_v3 = vrot.slane %v1343_v53, %v4190_v37 }
 0x451   : > { %v1823_v52 = vmul.f32 %v3352_v50, %v1809_v45 }
 0x452   : > { %v1321_v54 = vpop.permute.xlu0 %1320 }
 0x453   : > { %v1827_v55 = vsub.f32 2.0, %v1823_v52  ;;  %v1326_v57 = vcombine.low %v4249_v56, %v1321_v54  ;;  %v1327_v58 = vcombine.high %v4249_v56, %v1321_v54 }
 0x454   : > { %v3354_v59 = vpop.eup %3353 }
 0x455   : > { %v3356_v61 = vpop.eup %3355  ;;  %v1831_v62 = vmul.f32 %v3352_v50, %v1827_v55  ;;  %v1825_v63 = vmul.f32 %v3354_v59, %v1815_v46  ;;  %v1334_v0 = vrot.slane %v1326_v57, %v4190_v37  ;;  %v1341_v1 = vrot.slane %v1327_v58, %v4190_v37 }
 0x456   : > { %v1824_v2 = vmul.f32 %v3356_v61, %v1812_v47 }
 0x457   : > { %v1835_v5 = vmul.f32 %v3344_v34, %v1831_v62  ;;  %v1829_v6 = vsub.f32 2.0, %v1825_v63  ;;  %v1358_v8 = vcombine.low %v1334_v0, %v1350_v60  ;;  %v1359_v9 = vcombine.high %v1334_v0, %v1350_v60 }
 0x458   : > { %v1828_v10 = vsub.f32 2.0, %v1824_v2  ;;  %v1374_v56 = vcombine.low %v1341_v1, %v1357_v3  ;;  %v1375_v12 = vcombine.high %v1341_v1, %v1357_v3 }
 0x459   : > { %v3358_v33 = vpop.eup %3357  ;;  %1839 = vst.msk [vmem:[%s4136_s0] sm:$0xff] %vm1462_vm3, %v1835_v5  ;;  %v1833_v13 = vmul.f32 %v3354_v59, %v1829_v6  ;;  %v1366_v14 = vrot.slane %v1358_v8, %v4193_v44  ;;  %v1373_v15 = vrot.slane %v1359_v9, %v4193_v44 }
 0x45a   : > { %v1832_v16 = vmul.f32 %v3356_v61, %v1828_v10  ;;  %v1826_v17 = vmul.f32 %v3358_v33, %v1818_v49  ;;  %v1382_v18 = vrot.slane %v1374_v56, %v4193_v44  ;;  %v1389_v19 = vrot.slane %v1375_v12, %v4193_v44  ;;  %v2289_v49 = vld [vmem:[%s4664_s17 + $0x8] sm:$0xff]  ;;  %v2290_v10 = vld [vmem:[%s4664_s17 + $0x10] sm:$0xff]  ;;  %v2291_v56 = vld [vmem:[%s4664_s17 + $0x18] sm:$0xff] }
 0x45b   : > { %v1837_v20 = vmul.f32 %v3346_v36, %v1833_v13  ;;  %v1394_v21 = vcombine.low %v1366_v14, %v1373_v15  ;;  %v2942_v22 = vcombine.high %v1366_v14, %v1373_v15  ;;  %v3164_v50 = vpack.c.bf16 %v2289_v49, %v2288_v48 }
 0x45c   : > { %v1836_v23 = vmul.f32 %v3348_v38, %v1832_v16  ;;  %v1830_v24 = vsub.f32 2.0, %v1826_v17  ;;  %v1410_v25 = vcombine.low %v1382_v18, %v1389_v19  ;;  %v2943_v26 = vcombine.high %v1382_v18, %v1389_v19 }
 0x45d   : > { %1841 = vst.msk [vmem:[%s4136_s0 + $0x10] sm:$0xff] %vm1462_vm3, %v1837_v20  ;;  %v1401_v27 = vrot.slane %v1394_v21, %v4190_v37  ;;  %v1409_v28 = vrot.slane %v2942_v22, %v4190_v37  ;;  %v3167_v15 = vpack.c.bf16 %v2291_v56, %v2290_v10  ;;  %v2960_v10 = vld [vmem:[%s4668_s16] ss:$0 sm:$0xff] }
 0x45e   : > { %1840 = vst.msk [vmem:[%s4136_s0 + $0x8] sm:$0xff] %vm1462_vm3, %v1836_v23  ;;  %v1834_v29 = vmul.f32 %v3358_v33, %v1830_v24  ;;  %v1417_v30 = vrot.slane %v1410_v25, %v4190_v37  ;;  %v1425_v31 = vrot.slane %v2943_v26, %v4190_v37 }
 0x45f   : > { %v1426_v32 = vcombine.low %v1401_v27, %v1409_v28  ;;  %v1427_v34 = vcombine.high %v1401_v27, %v1409_v28 }
 0x460   : > { %v1838_v35 = vmul.f32 %v4270_v41, %v1834_v29  ;;  %v1442_v36 = vcombine.low %v1417_v30, %v1425_v31  ;;  %v1443_v38 = vcombine.high %v1417_v30, %v1425_v31 }
 0x461   : > { %v1434_v39 = vrot.slane %v1426_v32, %v4193_v44  ;;  %v1441_v42 = vrot.slane %v1427_v34, %v4193_v44 }
 0x462   : > { %1842 = vst.msk [vmem:[%s4136_s0 + $0x18] sm:$0xff] %vm1462_vm3, %v1838_v35  ;;  %v1450_v40 = vrot.slane %v1442_v36, %v4193_v44  ;;  %v1457_v43 = vrot.slane %v1443_v38, %v4193_v44 }
 0x464   : > { %v1458_v45 = vcombine.low %v1434_v39, %v1450_v40  ;;  %v1459_v46 = vcombine.high %v1434_v39, %v1450_v40  ;;  %v1460_v41 = vcombine.low %v1441_v42, %v1457_v43  ;;  %v1461_v47 = vcombine.high %v1441_v42, %v1457_v43 }
 0x466   : > { %3085 = vmatpush3.msra.mxu0 %v1458_v45  ;;  %3090 = vmatpush3.msra.mxu1 %v1459_v46 }
 0x467   : > { %3087 = vmatmul.mubr.msk.f32.vlgmr.msra.gmra.mrb[4].mxu0 %vm1462_vm3, %v1835_v5  ;;  %3092 = vmatmul.mubr.msk.f32.vlgmr.msra.gmra.mrb[10].mxu1 %vm1462_vm3, %v1836_v23 }
 0x468   : > { %3094 = vmatprep.subr.mxu0 %v3644_v7  ;;  %3099 = vmatprep.subr.mxu1 %v3644_v7 }
 0x469   : > { %3095 = vmatpush3.msra.mxu0 %v1460_v41  ;;  %3100 = vmatpush3.msra.mxu1 %v1461_v47 }
 0x46a   : > { %3096 = vmatprep.mubr.msk.f32.mxu0 %vm3643_vm1, %v3644_v7  ;;  %3101 = vmatprep.mubr.msk.f32.mxu1 %vm3643_vm1, %v3644_v7 }
 0x46b   : > { %3097 = vmatmul.mubr.msk.f32.vlgmr.msra.gmra.mrb[6].mxu0 %vm1462_vm3, %v1837_v20  ;;  %3102 = vmatmul.mubr.msk.f32.vlgmr.msra.gmra.mrb[12].mxu1 %vm1462_vm3, %v1838_v35 }
 0x46c   : > { %3163 = vmatprep.subr.bf16.mxu0 %v3642_v4  ;;  %3112 = vmatprep.mubr.msk.f32.mxu0 %vm3643_vm1, %v3644_v7 }
 0x46d   : > { %3169 = vmatprep.subr.bf16.mxu1 %v3642_v4  ;;  %3123 = vmatprep.mubr.msk.f32.mxu1 %vm3643_vm1, %v3644_v7 }
 0x46e   : > { %3165 = vmatpush3.bf16.msra.mxu0 %v3164_v50 }
 0x46f   : > { %3166 = vmatprep.subr.bf16.mxu0 %v3642_v4 }
 0x472   : > { %3168 = vmatpush3.bf16.msra.mxu0 %v3167_v15 }
 0x473   : > { %3175 = vmatprep.subr.bf16.mxu0 %v3642_v4 }
 0x53a   : > { %v1912_v51 = vpop.f32.mrb[4].mxu0  ;;  %v1985_v52 = vpop.f32.mrb[10].mxu1 }
 0x53b   : > { %v3088_v53 = vpop.f32.mrb[5].mxu0  ;;  %v3093_v54 = vpop.f32.mrb[11].mxu1 }
 0x53c   : > { %v2398_v53 = vld [vmem:[%s4130_s9 + $0x10] sm:$0xff]  ;;  %v2399_v54 = vld [vmem:[%s4130_s9 + $0x18] sm:$0xff] }
 0x53e   : > { %v2058_v55 = vpop.f32.mrb[6].mxu0  ;;  %v2131_v57 = vpop.f32.mrb[12].mxu1 }
 0x53f   : > { %v2135_v58 = vcombine.low %v1912_v51, %v2058_v55  ;;  %v2136_v59 = vcombine.high %v1912_v51, %v2058_v55  ;;  %v2151_v60 = vcombine.low %v1985_v52, %v2131_v57  ;;  %v2152_v61 = vcombine.high %v1985_v52, %v2131_v57  ;;  %v3098_v62 = vpop.f32.mrb[7].mxu0  ;;  %v3103_v63 = vpop.f32.mrb[13].mxu1  ;;  %v2397_v52 = vld [vmem:[%s4130_s9 + $0x8] sm:$0xff]  ;;  %v2481_v57 = vld [vmem:[%s4116_s26] sm:$0xff] }
 0x540   : > { %v3173_v55 = vpack.c.bf16 %v2399_v54, %v2398_v53  ;;  %v2485_v63 = vld [vmem:[%s4116_s26 + $0x20] sm:$0xff] }
 0x541   : > { %v2143_v0 = vrot.slane %v2135_v58, %v4190_v37  ;;  %v2150_v1 = vrot.slane %v2136_v59, %v4190_v37  ;;  %v2159_v2 = vrot.slane %v2151_v60, %v4190_v37  ;;  %v2166_v3 = vrot.slane %v2152_v61, %v4190_v37  ;;  %v2482_v58 = vld [vmem:[%s4116_s26 + $0x8] sm:$0xff]  ;;  %v2483_v59 = vld [vmem:[%s4116_s26 + $0x10] sm:$0xff]  ;;  %v2484_v61 = vld [vmem:[%s4116_s26 + $0x18] sm:$0xff] }
 0x542   : > { %v3176_v60 = vpack.c.bf16 %v2482_v58, %v2481_v57  ;;  %v3179_v62 = vpack.c.bf16 %v2484_v61, %v2483_v59 }
 0x543   : > { %v2167_v5 = vcombine.low %v2143_v0, %v2159_v2  ;;  %v2168_v6 = vcombine.high %v2143_v0, %v2159_v2  ;;  %v2183_v8 = vcombine.low %v2150_v1, %v2166_v3  ;;  %v2184_v9 = vcombine.high %v2150_v1, %v2166_v3  ;;  %v2486_v0 = vld [vmem:[%s4116_s26 + $0x28] sm:$0xff] }
 0x544   : > { %v3182_v1 = vpack.c.bf16 %v2486_v0, %v2485_v63 }
 0x545   : > { %v2175_v12 = vrot.slane %v2167_v5, %v4193_v44  ;;  %v2182_v33 = vrot.slane %v2168_v6, %v4193_v44  ;;  %v2191_v13 = vrot.slane %v2183_v8, %v4193_v44  ;;  %v2198_v14 = vrot.slane %v2184_v9, %v4193_v44  ;;  %v2959_v8 = vld [vmem:[%s4666_s7] ss:$0 sm:$0xff] }
 0x547   : > { %v2203_v16 = vcombine.low %v2175_v12, %v2182_v33  ;;  %v2956_v17 = vcombine.high %v2175_v12, %v2182_v33  ;;  %v2219_v18 = vcombine.low %v2191_v13, %v2198_v14  ;;  %v2957_v19 = vcombine.high %v2191_v13, %v2198_v14  ;;  %v2487_v12 = vld [vmem:[%s4116_s26 + $0x30] sm:$0xff]  ;;  %v2488_v33 = vld [vmem:[%s4116_s26 + $0x38] sm:$0xff]  ;;  %v2961_v14 = vld [vmem:[%s775_s18] ss:$0 sm:$0xff]  ;;  %s4673_s18 = sld [smem:[#allocation16_spill]]  ;;  %s4674_s26 = sld [smem:[#allocation36_spill]] }
 0x548   : > { %v3185_v13 = vpack.c.bf16 %v2488_v33, %v2487_v12 }
 0x549   : > { %v2210_v20 = vrot.slane %v2203_v16, %v4190_v37  ;;  %v2218_v21 = vrot.slane %v2956_v17, %v4190_v37  ;;  %v2226_v22 = vrot.slane %v2219_v18, %v4190_v37  ;;  %v2234_v23 = vrot.slane %v2957_v19, %v4190_v37  ;;  %v2963_v19 = vld [vmem:[%s783_s22] ss:$0 sm:$0xff]  ;;  %s2632_s22 = sadd.s32 %s2971_s29, %s2970_s2 }
 0x54a   : > { %s2972_s17 = sshll.u32 %s2632_s22, 7 }
 0x54b   : > { %v2236_v24 = vcombine.high %v2210_v20, %v2218_v21  ;;  %v2252_v25 = vcombine.high %v2226_v22, %v2234_v23  ;;  %v2235_v26 = vcombine.low %v2210_v20, %v2218_v21  ;;  %v2251_v27 = vcombine.low %v2226_v22, %v2234_v23  ;;  %s4396_s10 = scalar_lea.hbm %s4675_s12, %s2972_s17 }
 0x54d   : > { %v2250_v28 = vrot.slane %v2236_v24, %v4193_v44  ;;  %v2266_v29 = vrot.slane %v2252_v25, %v4193_v44  ;;  %v2243_v30 = vrot.slane %v2235_v26, %v4193_v44  ;;  %v2259_v31 = vrot.slane %v2251_v27, %v4193_v44  ;;  %s4676_s7 = sand.u32 1, %s4673_s18   ;;  %p4677_p11 = scmp.ne.s32.totalorder %s4674_s26, 0 }
 0x54e   : > { %s4402_s13 = scalar_lea.sflag [#allocation10], %s4676_s7 }
 0x54f   : > { %v2269_v32 = vcombine.low %v2250_v28, %v2266_v29  ;;  %v2268_v34 = vcombine.high %v2243_v30, %v2259_v31  ;;  %v2270_v35 = vcombine.high %v2250_v28, %v2266_v29  ;;  %v2267_v36 = vcombine.low %v2243_v30, %v2259_v31 }
 0x551   : > { %2276 = vrot.lane.b32.xlu0 %v2269_v32, %s3651_s28  ;;  %2272 = vrot.lane.b32.xlu1 %v2268_v34, %s3652_s4  ;;  %s2635_s28 = sshll.u32 %s4136_s0, 4  ;;  %s3457_s0 = sshll.u32 %s3654_s8, 4  ;;  %s4398_s28 = int_to_ptr.vmem [resolvable:$true] %s2635_s28  ;;  %s3458_s0 = int_to_ptr.vmem [resolvable:$false] %s3457_s0 }
 0x552   : > { %s3453_s20 = scalar_lea.vmem %s4398_s28, 512  ;;  %s3459_s16 = scalar_lea.vmem %s3458_s0, 1024 }
 0x553   : > { %p3454_p13 = scmp.ne.s32.totalorder %s4398_s28, %s3453_s20  ;;  %p3460_p5 = scmp.lt.s32.totalorder %s4398_s28, %s3458_s0 }
 0x554   : > { %p3461_p3 = scmp.lt.s32.totalorder %s3459_s16, %s3453_s20 }
 0x555   : > { %2280 = vrot.lane.b32.xlu1 %v2270_v35, %s3653_s1  ;;  %p3455_p10 = pnand %p3454_p13, %p4677_p11 }
 0x556   : > { %p3462_p9 = por %p3461_p3, %p3460_p5 }
 0x557   : > { %p3456_p8 = pneg %p3455_p10 }
 0x559   : > { %p3463_p4 = pnand %p3462_p9, %p3456_p8 }
 0x5c3   : > { %v2273_v37 = vpop.permute.xlu1 %2272  ;;  %v2277_v38 = vpop.permute.xlu0 %2276 }
 0x5c4   : > { %v2283_v39 = vsel %vm1462_vm3, %v2267_v36, %v2273_v37 }
 0x5c5   : > { %v2285_v44 = vsel %vm2284_vm6, %v2283_v39, %v2277_v38 }
 0x5c7   : > { %v2281_v40 = vpop.permute.xlu1 %2280 }
 0x5c8   : > { %v2287_v42 = vsel %vm2286_vm7, %v2285_v44, %v2281_v40 }
 0x5c9   : > { %3113 = vmatmul.mubr.msk.f32.vlgmr.msra.gmra.mrb[8].mxu0 %vm802_vm2, %v2287_v42 }
 0x5ca   : > { %3142 = vmatprep.mubr.msk.f32.mxu0 %vm3643_vm1, %v3644_v7  ;;  %v2396_v7 = vld [vmem:[%s4130_s9] sm:$0xff]  ;;  %3177 = vmatpush3.bf16.msra.mxu0 %v3176_v60 }
 0x5cb   : > { %3178 = vmatprep.subr.bf16.mxu0 %v3642_v4 }
 0x5ce   : > { %3180 = vmatpush3.bf16.msra.mxu0 %v3179_v62 }
 0x5cf   : > { %3181 = vmatprep.subr.bf16.mxu0 %v3642_v4 }
 0x5d2   : > { %3183 = vmatpush3.bf16.msra.mxu0 %v3182_v1 }
 0x5d3   : > { %3184 = vmatprep.subr.bf16.mxu0 %v3642_v4 }
 0x5d6   : > { %3186 = vmatpush3.bf16.msra.mxu0 %v3185_v13 }
 0x69c   : > { %v2361_v43 = vpop.f32.mrb[8].mxu0 }
 0x69d   : > { %v2365_v45 = vadd.f32 %v2361_v43, %v4151_v11  ;;  %v3114_v46 = vpop.f32.mrb[9].mxu0  ;;  %v3170_v11 = vpack.c.bf16 %v2397_v52, %v2396_v7 }
 0x69f   : > { %v2368_v41 = vsel %vm802_vm2, %v2365_v45, 0.0  ;;  %3171 = vmatpush3.bf16.msra.mxu1 %v3170_v11 }
 0x6a0   : > { %2369 = vadd.xlane.f32.xlu0 %v2368_v41  ;;  %3172 = vmatprep.subr.bf16.mxu1 %v3642_v4 }
 0x6a3   : > { %3174 = vmatpush3.bf16.msra.mxu1 %v3173_v55 }
 0x72d   : > { %v2370_v47 = vpop.xlane.xlu0 %2369 }
 0x72e   : > { %v2372_v48 = vmul.f32 0.03125, %v2370_v47 }
 0x730   : > { %v2373_v49 = vsub.f32 %v2365_v45, %v2372_v48 }
 0x732   : > { %v2374_v50 = vmul.f32 %v2373_v49, %v2373_v49 }
 0x734   : > { %v2375_v51 = vsel %vm802_vm2, %v2374_v50, 0.0 }
 0x735   : > { %2376 = vadd.xlane.f32.xlu1 %v2375_v51 }
 0x7c2   : > { %v2377_v2 = vpop.xlane.xlu1 %2376 }
 0x7c3   : > { %v2378_v3 = vmul.f32 0.03125, %v2377_v2 }
 0x7c5   : > { %v2379_v5 = vadd.f32 1e-05, %v2378_v3 }
 0x7c7   : > { %3359 = vrsqrt.f32 %v2379_v5 }
 0x7d1   : > { %v3360_v6 = vpop.eup %3359 }
 0x7d2   : > { %v2381_v9 = vmul.f32 %v3360_v6, %v2373_v49 }
 0x7d4   : > { %v2388_v56 = vmul.f32 %v2959_v8, %v2381_v9 }
 0x7d6   : > { %v2395_v4 = vadd.f32 %v2960_v10, %v2388_v56 }
 0x7d8   : > { %3124 = vmatmul.mubr.msk.f32.vlgmr.msra.gmra.mrb[14].mxu1 %vm802_vm2, %v2395_v4 }
 0x8ab   : > { %v2476_v15 = vpop.f32.mrb[14].mxu1 }
 0x8ac   : > { %v2477_v16 = vadd.f32 %v2961_v14, %v2476_v15  ;;  %v3125_v17 = vpop.f32.mrb[15].mxu1 }
 0x8ae   : > { %v2480_v18 = vmax.f32 %v2477_v16, 0.0 }
 0x8b0   : > { %3143 = vmatmul.mubr.msk.f32.vlgmr.msra.gmra.mrb[10].mxu0 %vm2496_vm8, %v2480_v18 }
 0x983   : > { %v2566_v20 = vpop.f32.mrb[10].mxu0 }
 0x984   : > { %v2567_v21 = vadd.f32 %v2963_v19, %v2566_v20  ;;  %v3144_v22 = vpop.f32.mrb[11].mxu0 }
 0x986   : > { %v2570_v23 = vadd.f32 %v2567_v21, %v2395_v4 }
 0x988   : > { %v2573_v24 = vsel %vm802_vm2, %v2570_v23, 0.0 }
 0x989   : > { %2574 = vadd.xlane.f32.xlu0 %v2573_v24 }
 0xa16   : > { %v2575_v25 = vpop.xlane.xlu0 %2574 }
 0xa17   : > { %v2576_v26 = vmul.f32 0.03125, %v2575_v25 }
 0xa19   : > { %v2577_v27 = vsub.f32 %v2570_v23, %v2576_v26 }
 0xa1b   : > { %v2578_v28 = vmul.f32 %v2577_v27, %v2577_v27 }
 0xa1d   : > { %v2579_v29 = vsel %vm802_vm2, %v2578_v28, 0.0 }
 0xa1e   : > { %2580 = vadd.xlane.f32.xlu0 %v2579_v29 }
 0xa1f   : > { %3466 = shalt.err (!%p3463_p4)
}
 0xa20   : > { %s3467_s15 = scalar_lea.hbm %s4396_s10, 512  ;;  %s3471_s25 = scalar_lea.hbm %s4675_s12, 2048 }
 0xa21   : > { %p3468_p0 = scmp.ne.s32.totalorder %s4396_s10, %s3467_s15  ;;  %p3472_p6 = scmp.lt.u32.totalorder %s4396_s10, %s4675_s12 }
 0xa22   : > { %p3473_p7 = scmp.lt.u32.totalorder %s3471_s25, %s3467_s15  ;;  %p3475_p13 = scmp.lt.u32.totalorder %s3467_s15, %s4396_s10 }
 0xa23   : > { %p3469_p1 = pnand %p3468_p0, %p4677_p11 }
 0xa24   : > { %p3474_p12 = por %p3473_p7, %p3472_p6 }
 0xa25   : > { %p3470_p2 = pneg %p3469_p1 }
 0xa26   : > { %p3476_p10 = por %p3475_p13, %p3474_p12 }
 0xa28   : > { %p3477_p8 = pnand %p3476_p10, %p3470_p2 }
 0xa2a   : > { %3480 = shalt.err (!%p3477_p8)
}
 0xa2b   : > { %s3655_s11 = smov 128   ;;  %s4678_s18 = sld [smem:[#allocation33_spill]]  ;;  %v2965_v35 = vld [vmem:[%s786_s27] ss:$0 sm:$0xff] }
 0xa2c   : > { %3194 = dma.vmem_to_hbm [thread:$0]  (%p4677_p11), %s4398_s28, 512, %s4396_s10, %s4402_s13, %s3655_s11, %s3655_s11, %s3652_s4  }
 0xa2d   : > { %v2966_v37 = vld [vmem:[%s789_s21] ss:$0 sm:$0xff]  ;;  %s2969_s14 = sshll.u32 %s4670_s19, 7  ;;  %s2620_s4 = sshll.u32 %s4134_s6, 4  ;;  %s4444_s4 = int_to_ptr.vmem [resolvable:$true] %s2620_s4 }
 0xa2e   : > { %s4681_s7 = sld [smem:[#allocation53_spill]]  ;;  %s2602_s27 = scalar_lea.sflag [#allocation4], %s4051_s3 }
 0xa2f   : > { %s3481_s20 = scalar_lea.vmem %s4444_s4, 128  ;;  %s3656_s21 = smov [#allocation8]  }
 0xa30   : > { %p3482_p11 = scmp.ne.s32.totalorder %s4444_s4, %s3481_s20  ;;  %s3485_s5 = sshll.u32 %s3656_s21, 4  ;;  %s3486_s5 = int_to_ptr.vmem [resolvable:$false] %s3485_s5 }
 0xa31   : > { %p4682_p5 = scmp.ne.s32.totalorder %s4678_s18, 0  ;;  %s3487_s19 = scalar_lea.vmem %s3486_s5, 256 }
 0xa32   : > { %p3488_p4 = scmp.lt.s32.totalorder %s4444_s4, %s3486_s5  ;;  %p3489_p0 = scmp.lt.s32.totalorder %s3487_s19, %s3481_s20 }
 0xa33   : > { %p3483_p3 = pnand %p3482_p11, %p4682_p5 }
 0xa34   : > { %s4442_s13 = scalar_lea.hbm %s4681_s7, %s2969_s14  ;;  %p3490_p1 = por %p3489_p0, %p3488_p4 }
 0xa35   : > { %p3484_p9 = pneg %p3483_p3 }
 0xa37   : > { %p3491_p2 = pnand %p3490_p1, %p3484_p9 }
 0xaab   : > { %v2581_v30 = vpop.xlane.xlu0 %2580 }
 0xaac   : > { %v2582_v31 = vmul.f32 0.03125, %v2581_v30 }
 0xaae   : > { %v2583_v32 = vadd.f32 1e-05, %v2582_v31 }
 0xab0   : > { %3361 = vrsqrt.f32 %v2583_v32 }
 0xaba   : > { %v3362_v34 = vpop.eup %3361 }
 0xabb   : > { %v2585_v36 = vmul.f32 %v3362_v34, %v2577_v27 }
 0xabd   : > { %v2592_v38 = vmul.f32 %v2965_v35, %v2585_v36 }
 0xabf   : > { %v2599_v39 = vadd.f32 %v2966_v37, %v2592_v38 }
 0xac1   : > { %2600 = vst.msk [vmem:[%s4134_s6] sm:$0xff] %vm802_vm2, %v2599_v39 }
 0xac2   : > { %3494 = shalt.err (!%p3491_p2)
}
 0xac3   : > { %s3495_s3 = scalar_lea.hbm %s4442_s13, 128  ;;  %s3499_s0 = scalar_lea.hbm %s4681_s7, 256 }
 0xac4   : > { %p3496_p6 = scmp.ne.s32.totalorder %s4442_s13, %s3495_s3  ;;  %p3500_p13 = scmp.lt.u32.totalorder %s4442_s13, %s4681_s7 }
 0xac5   : > { %p3501_p10 = scmp.lt.u32.totalorder %s3499_s0, %s3495_s3  ;;  %p3503_p11 = scmp.lt.u32.totalorder %s3495_s3, %s4442_s13 }
 0xac6   : > { %p3497_p7 = pnand %p3496_p6, %p4682_p5 }
 0xac7   : > { %p3502_p8 = por %p3501_p10, %p3500_p13 }
 0xac8   : > { %p3498_p12 = pneg %p3497_p7 }
 0xac9   : > { %p3504_p3 = por %p3503_p11, %p3502_p8 }
 0xacb   : > { %p3505_p9 = pnand %p3504_p3, %p3498_p12 }
 0xacd   : > { %3508 = shalt.err (!%p3505_p9)
}
 0xace   : > { %3193 = dma.vmem_to_hbm [thread:$0]  (%p4682_p5), %s4444_s4, 128, %s4442_s13, %s2602_s27  }
 0xacf PF: > { %s4683_s9 = sld [smem:[#allocation27_spill]]  ;;  %s4684_s23 = sld [smem:[#allocation20_spill]] }
 0xad0   : > { %s4685_s25 = sld [smem:[#allocation34_spill]] }
 0xad5   : > { %p3215_p4 = scmp.ge.s32.totalorder %s4683_s9, 2  ;;  %s2650_s30 = sand.u32 1, %s4684_s23  }
 0xad6   : > { %p4686_p0 = scmp.ne.s32.totalorder %s4685_s25, 0  ;;  %s2651_s24 = scalar_lea.sflag [#allocation4], %s2650_s30 }
 0xad8   : > { %p3208_p1 = pnand %p3215_p4, %p4686_p0 }
 0xada   : > { %3574 = dma.done.wait (!%p3208_p1), %s2651_s24, 128  }
 0xadb   : > { %3576 = vsyncadd (!%p3208_p1), %s2651_s24, 4294967168  ;;  %s4687_s11 = sld [smem:[#allocation15_spill]]  ;;  %s4688_s2 = sld [smem:[#allocation37_spill]] }
 0xae1   : > { %s2659_s29 = sand.u32 1, %s4687_s11   ;;  %p4689_p2 = scmp.ne.s32.totalorder %s4688_s2, 0 }
 0xae2   : > { %s2660_s18 = scalar_lea.sflag [#allocation10], %s2659_s29 }
 0xae3   : > { %p3211_p6 = pnand %p3215_p4, %p4689_p2 }
 0xae5   : > { %3578 = dma.done.wait (!%p3211_p6), %s2660_s18, 512  }
 0xae6   : > { %3580 = vsyncadd (!%p3211_p6), %s2660_s18, 4294966784  ;;  %s38_s16 = sadd.s32 1, %s4683_s9   ;;  %s4691_s18 = sld [smem:[#allocation16_spill]] }
 0xae7   : > { %p4478_p5 = scmp.ge.s32.totalorder %s38_s16, 6   ;;  %s4692_s19 = sld [smem:[#allocation17_spill]] }
 0xae8   : > { %s4693_s20 = sld [smem:[#allocation35_spill]]  ;;  %s4694_s21 = sld [smem:[#allocation18_spill]] }
 0xae9   : > { %s4695_s22 = sld [smem:[#allocation19_spill]]  ;;  %s4696_s23 = sld [smem:[#allocation31_spill]] }
 0xaea   : > { %s4697_s24 = sld [smem:[#allocation21_spill]]  ;;  %s4698_s25 = sld [smem:[#allocation22_spill]] }
 0xaeb   : > { %s4699_s17 = sld [smem:[#allocation32_spill]]  ;;  %s4700_s27 = sld [smem:[#allocation25_spill]] }
 0xaec   : > { %s4701_s28 = sld [smem:[#allocation26_spill]]  ;;  %s4702_s29 = sld [smem:[#allocation28_spill]] }
 0xaed   : > { %s4703_s30 = sld [smem:[#allocation30_spill]]  ;;  %37 = sbr.rel (!%p4478_p5) target bundleno = 31 (0x1f), region = 199 }
 0xaf1   : > { %s4705_s26 = smov %s4699_s17 }
 0xaf4   :  { %2665 = vsyncpa [#allocation3], 1 }
 0xaf5   :  { %2667 = vsyncpa [#allocation3 + $0x1], 1 }
 0xaf6   :  { %2668 = vsyncpa [#allocation6], 1 }
 0xaf7   :  { %2670 = vsyncpa [#allocation6 + $0x1], 1 }
 0xaf8   :  { %2671 = vsyncpa [#allocation4], 1 }
 0xaf9   :  { %2673 = vsyncpa [#allocation4 + $0x1], 1 }
 0xafa   :  { %2674 = vsyncpa [#allocation10], 1 }
 0xafb   :  { %2676 = vsyncpa [#allocation10 + $0x1], 1 }

</bundles_post_ra>
